<compile_context>
chip_gen: v7x
topology: tpu7x:2x2x1
jax: 0.10.0
libtpu: 0.0.40
codegen_flags: <defaults>
</compile_context>

<pallas_src>
import functools

import jax
import jax.numpy as jnp
from jax.experimental import pallas as pl
from jax.experimental.pallas import tpu as pltpu

NUM_LAYERS = 2


def _lstm_cell(gates, c_prev, H):
    """LSTM cell update from pre-activation gates (B, 4H); all math in f32.

    One full-width sigmoid pass over the whole (B, 4H) gates vreg, then i/f/o
    are sliced out of the activated result (fewer EUP pushes than three
    separate 32-lane sigmoids)."""
    sg = jax.nn.sigmoid(gates)                       # single full-width EUP pass
    i_g = sg[:, 0 * H:1 * H]
    f_g = sg[:, 1 * H:2 * H]
    o_g = sg[:, 3 * H:4 * H]
    g_g = jnp.tanh(gates[:, 2 * H:3 * H])
    c_new = f_g * c_prev + i_g * g_g
    h_new = o_g * jnp.tanh(c_new)
    return h_new, c_new


def _lstm_encoder_kernel(T, B,
                         x_ref, wih0_ref, wbig_ref, b0_ref, b1_ref,
                         fcw_ref, fcb_ref,
                         hseq_ref, hn_ref, cn_ref,
                         h1_buf):
    """Single-invocation kernel: full sequence + all weights resident in VMEM.

    x_ref:    (T*B, D)  f32   time-major flattened input
    wih0_ref: (D, 4H)   bf16  layer-0 input->gate weights (pre-transposed)
    wbig_ref: (H, 12H)  bf16  [Whh0 | Wih1 | Whh1] pre-transposed + concatenated
    b0_ref:   (1, 4H)   f32   layer-0 bias (b_ih + b_hh)
    b1_ref:   (1, 4H)   f32   layer-1 bias (b_ih + b_hh)
    fcw_ref:  (H, H)    bf16  fc weight (pre-transposed)
    fcb_ref:  (1, H)    f32   fc bias
    hseq_ref: (T*B, H)  f32   fc(h_seq) output (reshaped to (T,B,H) by the wrapper)
    hn_ref:   (2, B, H) f32   final hidden states
    cn_ref:   (2, B, H) f32   final cell states
    h1_buf:   (T*B, H)  f32   VMEM scratch holding per-timestep layer-1 hidden states
    """
    D = x_ref.shape[-1]
    H = D
    H4 = 4 * H

    # Hoisted layer-0 input projection for ALL timesteps: one (T*B,D)@(D,4H) MXU op
    # with bf16 operands + f32 accumulation (off the serial path).
    xg0 = (jnp.dot(x_ref[...].astype(jnp.bfloat16), wih0_ref[...],
                   preferred_element_type=jnp.float32)
           + b0_ref[...])                                        # (T*B, 4H) f32

    b1 = b1_ref[...]                                             # loop-invariant load

    h0 = jnp.zeros((B, H), jnp.float32)
    c0 = jnp.zeros((B, H), jnp.float32)
    h1 = jnp.zeros((B, H), jnp.float32)
    c1 = jnp.zeros((B, H), jnp.float32)

    # Wavefront over the two layers: at step s layer 0 processes timestep s and
    # layer 1 processes timestep s-1, so the serial chain is T+1 (not 2T) matmuls.
    # Exactly one MXU op per step: [h0; h1](2B,H) @ [Whh0 | Wih1 | Whh1](H,12H).
    for s in range(T + 1):                          # small & static -> unrolled
        hh = jnp.concatenate([h0, h1], axis=0).astype(jnp.bfloat16)          # (2B, H)
        r = jnp.dot(hh, wbig_ref[...], preferred_element_type=jnp.float32)   # (2B,12H)

        if s < T:                                   # layer 0, timestep s
            gates0 = xg0[s * B:(s + 1) * B, :] + r[:B, 0:H4]
            h0, c0 = _lstm_cell(gates0, c0, H)

        if s >= 1:                                  # layer 1, timestep s-1
            gates1 = r[:B, H4:2 * H4] + r[B:, 2 * H4:3 * H4] + b1
            h1, c1 = _lstm_cell(gates1, c1, H)
            h1_buf[(s - 1) * B:s * B, :] = h1       # static, 8-row-aligned store

    hn_ref[0] = h0.astype(hn_ref.dtype)
    cn_ref[0] = c0.astype(cn_ref.dtype)
    hn_ref[1] = h1.astype(hn_ref.dtype)
    cn_ref[1] = c1.astype(cn_ref.dtype)

    # Hoisted fc projection: one (T*B,H)@(H,H) bf16 matmul + a single bulk store.
    out = (jnp.dot(h1_buf[...].astype(jnp.bfloat16), fcw_ref[...],
                   preferred_element_type=jnp.float32)
           + fcb_ref[...])
    hseq_ref[...] = out.astype(hseq_ref.dtype)


def prepare_params(wih, whh, bih, bhh, fcw, fcb):
    """One-time layout prep. Call once at parameter-load time, NOT per forward call.

    Transposes every weight so each in-kernel matmul is a native (M,K)@(K,N) MXU op,
    folds the two LSTM biases, concatenates the wavefront RHS [Whh0 | Wih1 | Whh1],
    and casts all MXU operands to bf16."""
    H = fcw.shape[0]
    wih0_t = wih[0].T.astype(jnp.bfloat16)                             # (D, 4H)
    wbig = jnp.concatenate([whh[0].T, wih[1].T, whh[1].T],
                           axis=1).astype(jnp.bfloat16)                # (H, 12H)
    b0 = (bih[0] + bhh[0]).reshape(1, 4 * H).astype(jnp.float32)
    b1 = (bih[1] + bhh[1]).reshape(1, 4 * H).astype(jnp.float32)
    fcw_t = fcw.T.astype(jnp.bfloat16)                                 # (H, H)
    fcb2 = fcb.reshape(1, H).astype(jnp.float32)
    return (wih0_t, wbig, b0, b1, fcw_t, fcb2)


@jax.jit
def lstm_encoder_forward(x, params):
    """x: (T, B, D) f32; params from prepare_params().
    Returns (h_seq (T,B,D), (h_n (2,B,D), c_n (2,B,D)))."""
    T, B, D = x.shape
    H = D
    wih0_t, wbig, b0, b1, fcw_t, fcb2 = params
    x2d = x.reshape(T * B, D)                       # metadata-only reshape

    kernel = functools.partial(_lstm_encoder_kernel, T, B)
    vmem = pltpu.MemorySpace.VMEM

    hseq2d, h_n, c_n = pl.pallas_call(
        kernel,
        out_shape=(
            jax.ShapeDtypeStruct((T * B, H), jnp.float32),
            jax.ShapeDtypeStruct((NUM_LAYERS, B, H), jnp.float32),
            jax.ShapeDtypeStruct((NUM_LAYERS, B, H), jnp.float32),
        ),
        in_specs=[pl.BlockSpec(memory_space=vmem)] * 7,
        out_specs=(
            pl.BlockSpec(memory_space=vmem),
            pl.BlockSpec(memory_space=vmem),
            pl.BlockSpec(memory_space=vmem),
        ),
        scratch_shapes=[pltpu.VMEM((T * B, H), jnp.float32)],
    )(x2d, wih0_t, wbig, b0, b1, fcw_t, fcb2)

    return hseq2d.reshape(T, B, H), (h_n, c_n)


def ref_forward(x, wih, whh, bih, bhh, fcw, fcb):
    """Pure-JAX f32 reference matching torch.nn.LSTM (2 layers) + per-timestep Linear."""
    T, B, D = x.shape
    H = D
    h_ns, c_ns = [], []
    layer_in = x
    for l in range(NUM_LAYERS):
        def step(carry, x_t, l=l):
            h, c = carry
            gates = x_t @ wih[l].T + bih[l] + h @ whh[l].T + bhh[l]
            i, f, g, o = jnp.split(gates, 4, axis=-1)
            i = jax.nn.sigmoid(i)
            f = jax.nn.sigmoid(f)
            g = jnp.tanh(g)
            o = jax.nn.sigmoid(o)
            c = f * c + i * g
            h = o * jnp.tanh(c)
            return (h, c), h
        init = (jnp.zeros((B, H), jnp.float32), jnp.zeros((B, H), jnp.float32))
        (h_f, c_f), outs = jax.lax.scan(step, init, layer_in)
        h_ns.append(h_f)
        c_ns.append(c_f)
        layer_in = outs
    h_seq = layer_in @ fcw.T + fcb
    return h_seq, (jnp.stack(h_ns), jnp.stack(c_ns))


if __name__ == "__main__":
    T, B, D = 8, 8, 32   # seq_len, batch (fills sublanes), input_size (= hidden_size)
    H = D

    key = jax.random.PRNGKey(0)
    ks = jax.random.split(key, 8)
    bound = 1.0 / jnp.sqrt(H)

    x = jax.random.normal(ks[0], (T, B, D), dtype=jnp.float32)
    # per-layer LSTM parameters (input_size == hidden_size so all layers share shapes)
    wih = jax.random.uniform(ks[1], (NUM_LAYERS, 4 * H, D), jnp.float32, -bound, bound)
    whh = jax.random.uniform(ks[2], (NUM_LAYERS, 4 * H, H), jnp.float32, -bound, bound)
    bih = jax.random.uniform(ks[3], (NUM_LAYERS, 4 * H), jnp.float32, -bound, bound)
    bhh = jax.random.uniform(ks[4], (NUM_LAYERS, 4 * H), jnp.float32, -bound, bound)
    fcw = jax.random.uniform(ks[5], (H, H), jnp.float32, -bound, bound)
    fcb = jax.random.uniform(ks[6], (H,), jnp.float32, -bound, bound)

    # One-time parameter prep (outside the per-call forward path).
    params = prepare_params(wih, whh, bih, bhh, fcw, fcb)
    jax.block_until_ready(params)

    h_seq, (h_n, c_n) = lstm_encoder_forward(x, params)
    jax.block_until_ready((h_seq, h_n, c_n))

    h_seq_ref, (h_n_ref, c_n_ref) = ref_forward(x, wih, whh, bih, bhh, fcw, fcb)

    assert h_seq.shape == (T, B, H)
    assert h_n.shape == (NUM_LAYERS, B, H)
    assert c_n.shape == (NUM_LAYERS, B, H)
    # Tolerance relaxed vs. the all-f32 version because MXU operands are now bf16
    # (f32 accumulation); genuine bugs produce errors of O(output magnitude) >> 3e-2.
    assert jnp.allclose(h_seq, h_seq_ref, rtol=3e-2, atol=3e-2)
    assert jnp.allclose(h_n, h_n_ref, rtol=3e-2, atol=3e-2)
    assert jnp.allclose(c_n, c_n_ref, rtol=3e-2, atol=3e-2)

    print("KERNEL_OK")
</pallas_src>

<mosaic_0001>
module attributes {stable_mosaic.version = 11 : i64} {
  func.func @_lstm_encoder_kernel(%arg0: memref<64x32xf32, #tpu.memory_space<vmem>>, %arg1: memref<32x128xbf16, #tpu.memory_space<vmem>>, %arg2: memref<32x384xbf16, #tpu.memory_space<vmem>>, %arg3: memref<1x128xf32, #tpu.memory_space<vmem>>, %arg4: memref<1x128xf32, #tpu.memory_space<vmem>>, %arg5: memref<32x32xbf16, #tpu.memory_space<vmem>>, %arg6: memref<1x32xf32, #tpu.memory_space<vmem>>, %arg7: memref<64x32xf32, #tpu.memory_space<vmem>>, %arg8: memref<2x8x32xf32, #tpu.memory_space<vmem>>, %arg9: memref<2x8x32xf32, #tpu.memory_space<vmem>>, %arg10: memref<64x32xf32, #tpu.memory_space<vmem>>) attributes {dimension_semantics = [], scalar_prefetch = 0 : i64, scratch_operands = 1 : i64, tpu.core_type = #tpu.core_type<tc>} {
    %c0 = arith.constant 0 : index
    %c0_0 = arith.constant 0 : index
    %0 = vector.load %arg0[%c0, %c0_0] : memref<64x32xf32, #tpu.memory_space<vmem>>, vector<64x32xf32>
    %1 = arith.truncf %0 : vector<64x32xf32> to vector<64x32xbf16>
    %c0_1 = arith.constant 0 : index
    %c0_2 = arith.constant 0 : index
    %2 = vector.load %arg1[%c0_1, %c0_2] : memref<32x128xbf16, #tpu.memory_space<vmem>>, vector<32x128xbf16>
    %cst = arith.constant dense<0.000000e+00> : vector<64x128xf32>
    %3 = tpu.matmul %1, %2, %cst {dimension_numbers = #tpu.dot_dimension_numbers<[1], [0], [0], [1], [0, 0, 1, 1], [], []>} : vector<64x32xbf16>, vector<32x128xbf16>, vector<64x128xf32> -> vector<64x128xf32>
    %c0_3 = arith.constant 0 : index
    %c0_4 = arith.constant 0 : index
    %4 = vector.load %arg3[%c0_3, %c0_4] : memref<1x128xf32, #tpu.memory_space<vmem>>, vector<1x128xf32>
    %5 = vector.broadcast %4 : vector<1x128xf32> to vector<64x128xf32>
    %6 = arith.addf %3, %5 : vector<64x128xf32>
    %c0_5 = arith.constant 0 : index
    %c0_6 = arith.constant 0 : index
    %7 = vector.load %arg4[%c0_5, %c0_6] : memref<1x128xf32, #tpu.memory_space<vmem>>, vector<1x128xf32>
    %cst_7 = arith.constant 0.000000e+00 : f32
    %8 = vector.broadcast %cst_7 : f32 to vector<8x32xf32>
    %cst_8 = arith.constant 0.000000e+00 : f32
    %9 = vector.broadcast %cst_8 : f32 to vector<8x32xf32>
    %cst_9 = arith.constant 0.000000e+00 : f32
    %10 = vector.broadcast %cst_9 : f32 to vector<8x32xf32>
    %cst_10 = arith.constant 0.000000e+00 : f32
    %11 = vector.broadcast %cst_10 : f32 to vector<8x32xf32>
    %12 = tpu.concatenate %8, %10 in 0 : vector<8x32xf32>, vector<8x32xf32> -> vector<16x32xf32>
    %13 = arith.truncf %12 : vector<16x32xf32> to vector<16x32xbf16>
    %c0_11 = arith.constant 0 : index
    %c0_12 = arith.constant 0 : index
    %14 = vector.load %arg2[%c0_11, %c0_12] : memref<32x384xbf16, #tpu.memory_space<vmem>>, vector<32x384xbf16>
    %cst_13 = arith.constant dense<0.000000e+00> : vector<16x384xf32>
    %15 = tpu.matmul %13, %14, %cst_13 {dimension_numbers = #tpu.dot_dimension_numbers<[1], [0], [0], [1], [0, 0, 1, 1], [], []>} : vector<16x32xbf16>, vector<32x384xbf16>, vector<16x384xf32> -> vector<16x384xf32>
    %16 = vector.extract_strided_slice %6 {offsets = [0, 0], sizes = [8, 128], strides = [1, 1]} : vector<64x128xf32> to vector<8x128xf32>
    %17 = vector.extract_strided_slice %15 {offsets = [0, 0], sizes = [8, 128], strides = [1, 1]} : vector<16x384xf32> to vector<8x128xf32>
    %18 = arith.addf %16, %17 : vector<8x128xf32>
    %19 = arith.negf %18 : vector<8x128xf32>
    %20 = math.exp %19 : vector<8x128xf32>
    %cst_14 = arith.constant 1.000000e+00 : f32
    %21 = vector.broadcast %cst_14 : f32 to vector<8x128xf32>
    %22 = arith.addf %21, %20 : vector<8x128xf32>
    %23 = arith.divf %21, %22 : vector<8x128xf32>
    %24 = vector.extract_strided_slice %23 {offsets = [0, 0], sizes = [8, 32], strides = [1, 1]} : vector<8x128xf32> to vector<8x32xf32>
    %25 = vector.extract_strided_slice %23 {offsets = [0, 32], sizes = [8, 32], strides = [1, 1]} : vector<8x128xf32> to vector<8x32xf32>
    %26 = vector.extract_strided_slice %23 {offsets = [0, 96], sizes = [8, 32], strides = [1, 1]} : vector<8x128xf32> to vector<8x32xf32>
    %27 = vector.extract_strided_slice %18 {offsets = [0, 64], sizes = [8, 32], strides = [1, 1]} : vector<8x128xf32> to vector<8x32xf32>
    %28 = math.tanh %27 : vector<8x32xf32>
    %29 = arith.mulf %25, %9 : vector<8x32xf32>
    %30 = arith.mulf %24, %28 : vector<8x32xf32>
    %31 = arith.addf %29, %30 : vector<8x32xf32>
    %32 = math.tanh %31 : vector<8x32xf32>
    %33 = arith.mulf %26, %32 : vector<8x32xf32>
    %34 = tpu.concatenate %33, %10 in 0 : vector<8x32xf32>, vector<8x32xf32> -> vector<16x32xf32>
    %35 = arith.truncf %34 : vector<16x32xf32> to vector<16x32xbf16>
    %c0_15 = arith.constant 0 : index
    %c0_16 = arith.constant 0 : index
    %36 = vector.load %arg2[%c0_15, %c0_16] : memref<32x384xbf16, #tpu.memory_space<vmem>>, vector<32x384xbf16>
    %cst_17 = arith.constant dense<0.000000e+00> : vector<16x384xf32>
    %37 = tpu.matmul %35, %36, %cst_17 {dimension_numbers = #tpu.dot_dimension_numbers<[1], [0], [0], [1], [0, 0, 1, 1], [], []>} : vector<16x32xbf16>, vector<32x384xbf16>, vector<16x384xf32> -> vector<16x384xf32>
    %38 = vector.extract_strided_slice %6 {offsets = [8, 0], sizes = [8, 128], strides = [1, 1]} : vector<64x128xf32> to vector<8x128xf32>
    %39 = vector.extract_strided_slice %37 {offsets = [0, 0], sizes = [8, 128], strides = [1, 1]} : vector<16x384xf32> to vector<8x128xf32>
    %40 = arith.addf %38, %39 : vector<8x128xf32>
    %41 = arith.negf %40 : vector<8x128xf32>
    %42 = math.exp %41 : vector<8x128xf32>
    %cst_18 = arith.constant 1.000000e+00 : f32
    %43 = vector.broadcast %cst_18 : f32 to vector<8x128xf32>
    %44 = arith.addf %43, %42 : vector<8x128xf32>
    %45 = arith.divf %43, %44 : vector<8x128xf32>
    %46 = vector.extract_strided_slice %45 {offsets = [0, 0], sizes = [8, 32], strides = [1, 1]} : vector<8x128xf32> to vector<8x32xf32>
    %47 = vector.extract_strided_slice %45 {offsets = [0, 32], sizes = [8, 32], strides = [1, 1]} : vector<8x128xf32> to vector<8x32xf32>
    %48 = vector.extract_strided_slice %45 {offsets = [0, 96], sizes = [8, 32], strides = [1, 1]} : vector<8x128xf32> to vector<8x32xf32>
    %49 = vector.extract_strided_slice %40 {offsets = [0, 64], sizes = [8, 32], strides = [1, 1]} : vector<8x128xf32> to vector<8x32xf32>
    %50 = math.tanh %49 : vector<8x32xf32>
    %51 = arith.mulf %47, %31 : vector<8x32xf32>
    %52 = arith.mulf %46, %50 : vector<8x32xf32>
    %53 = arith.addf %51, %52 : vector<8x32xf32>
    %54 = math.tanh %53 : vector<8x32xf32>
    %55 = arith.mulf %48, %54 : vector<8x32xf32>
    %56 = vector.extract_strided_slice %37 {offsets = [0, 128], sizes = [8, 128], strides = [1, 1]} : vector<16x384xf32> to vector<8x128xf32>
    %57 = vector.extract_strided_slice %37 {offsets = [8, 256], sizes = [8, 128], strides = [1, 1]} : vector<16x384xf32> to vector<8x128xf32>
    %58 = arith.addf %56, %57 : vector<8x128xf32>
    %59 = vector.broadcast %7 : vector<1x128xf32> to vector<8x128xf32>
    %60 = arith.addf %58, %59 : vector<8x128xf32>
    %61 = arith.negf %60 : vector<8x128xf32>
    %62 = math.exp %61 : vector<8x128xf32>
    %cst_19 = arith.constant 1.000000e+00 : f32
    %63 = vector.broadcast %cst_19 : f32 to vector<8x128xf32>
    %64 = arith.addf %63, %62 : vector<8x128xf32>
    %65 = arith.divf %63, %64 : vector<8x128xf32>
    %66 = vector.extract_strided_slice %65 {offsets = [0, 0], sizes = [8, 32], strides = [1, 1]} : vector<8x128xf32> to vector<8x32xf32>
    %67 = vector.extract_strided_slice %65 {offsets = [0, 32], sizes = [8, 32], strides = [1, 1]} : vector<8x128xf32> to vector<8x32xf32>
    %68 = vector.extract_strided_slice %65 {offsets = [0, 96], sizes = [8, 32], strides = [1, 1]} : vector<8x128xf32> to vector<8x32xf32>
    %69 = vector.extract_strided_slice %60 {offsets = [0, 64], sizes = [8, 32], strides = [1, 1]} : vector<8x128xf32> to vector<8x32xf32>
    %70 = math.tanh %69 : vector<8x32xf32>
    %71 = arith.mulf %67, %11 : vector<8x32xf32>
    %72 = arith.mulf %66, %70 : vector<8x32xf32>
    %73 = arith.addf %71, %72 : vector<8x32xf32>
    %74 = math.tanh %73 : vector<8x32xf32>
    %75 = arith.mulf %68, %74 : vector<8x32xf32>
    %c0_20 = arith.constant 0 : index
    %c0_21 = arith.constant 0 : index
    %76 = vector.load %arg10[%c0_20, %c0_21] : memref<64x32xf32, #tpu.memory_space<vmem>>, vector<8x32xf32>
    tpu.vector_store %arg10[%c0_20, %c0_21], %75 {strides = array<i32>} : memref<64x32xf32, #tpu.memory_space<vmem>>, vector<8x32xf32>,
    %77 = tpu.concatenate %55, %75 in 0 : vector<8x32xf32>, vector<8x32xf32> -> vector<16x32xf32>
    %78 = arith.truncf %77 : vector<16x32xf32> to vector<16x32xbf16>
    %c0_22 = arith.constant 0 : index
    %c0_23 = arith.constant 0 : index
    %79 = vector.load %arg2[%c0_22, %c0_23] : memref<32x384xbf16, #tpu.memory_space<vmem>>, vector<32x384xbf16>
    %cst_24 = arith.constant dense<0.000000e+00> : vector<16x384xf32>
    %80 = tpu.matmul %78, %79, %cst_24 {dimension_numbers = #tpu.dot_dimension_numbers<[1], [0], [0], [1], [0, 0, 1, 1], [], []>} : vector<16x32xbf16>, vector<32x384xbf16>, vector<16x384xf32> -> vector<16x384xf32>
    %81 = vector.extract_strided_slice %6 {offsets = [16, 0], sizes = [8, 128], strides = [1, 1]} : vector<64x128xf32> to vector<8x128xf32>
    %82 = vector.extract_strided_slice %80 {offsets = [0, 0], sizes = [8, 128], strides = [1, 1]} : vector<16x384xf32> to vector<8x128xf32>
    %83 = arith.addf %81, %82 : vector<8x128xf32>
    %84 = arith.negf %83 : vector<8x128xf32>
    %85 = math.exp %84 : vector<8x128xf32>
    %cst_25 = arith.constant 1.000000e+00 : f32
    %86 = vector.broadcast %cst_25 : f32 to vector<8x128xf32>
    %87 = arith.addf %86, %85 : vector<8x128xf32>
    %88 = arith.divf %86, %87 : vector<8x128xf32>
    %89 = vector.extract_strided_slice %88 {offsets = [0, 0], sizes = [8, 32], strides = [1, 1]} : vector<8x128xf32> to vector<8x32xf32>
    %90 = vector.extract_strided_slice %88 {offsets = [0, 32], sizes = [8, 32], strides = [1, 1]} : vector<8x128xf32> to vector<8x32xf32>
    %91 = vector.extract_strided_slice %88 {offsets = [0, 96], sizes = [8, 32], strides = [1, 1]} : vector<8x128xf32> to vector<8x32xf32>
    %92 = vector.extract_strided_slice %83 {offsets = [0, 64], sizes = [8, 32], strides = [1, 1]} : vector<8x128xf32> to vector<8x32xf32>
    %93 = math.tanh %92 : vector<8x32xf32>
    %94 = arith.mulf %90, %53 : vector<8x32xf32>
    %95 = arith.mulf %89, %93 : vector<8x32xf32>
    %96 = arith.addf %94, %95 : vector<8x32xf32>
    %97 = math.tanh %96 : vector<8x32xf32>
    %98 = arith.mulf %91, %97 : vector<8x32xf32>
    %99 = vector.extract_strided_slice %80 {offsets = [0, 128], sizes = [8, 128], strides = [1, 1]} : vector<16x384xf32> to vector<8x128xf32>
    %100 = vector.extract_strided_slice %80 {offsets = [8, 256], sizes = [8, 128], strides = [1, 1]} : vector<16x384xf32> to vector<8x128xf32>
    %101 = arith.addf %99, %100 : vector<8x128xf32>
    %102 = vector.broadcast %7 : vector<1x128xf32> to vector<8x128xf32>
    %103 = arith.addf %101, %102 : vector<8x128xf32>
    %104 = arith.negf %103 : vector<8x128xf32>
    %105 = math.exp %104 : vector<8x128xf32>
    %cst_26 = arith.constant 1.000000e+00 : f32
    %106 = vector.broadcast %cst_26 : f32 to vector<8x128xf32>
    %107 = arith.addf %106, %105 : vector<8x128xf32>
    %108 = arith.divf %106, %107 : vector<8x128xf32>
    %109 = vector.extract_strided_slice %108 {offsets = [0, 0], sizes = [8, 32], strides = [1, 1]} : vector<8x128xf32> to vector<8x32xf32>
    %110 = vector.extract_strided_slice %108 {offsets = [0, 32], sizes = [8, 32], strides = [1, 1]} : vector<8x128xf32> to vector<8x32xf32>
    %111 = vector.extract_strided_slice %108 {offsets = [0, 96], sizes = [8, 32], strides = [1, 1]} : vector<8x128xf32> to vector<8x32xf32>
    %112 = vector.extract_strided_slice %103 {offsets = [0, 64], sizes = [8, 32], strides = [1, 1]} : vector<8x128xf32> to vector<8x32xf32>
    %113 = math.tanh %112 : vector<8x32xf32>
    %114 = arith.mulf %110, %73 : vector<8x32xf32>
    %115 = arith.mulf %109, %113 : vector<8x32xf32>
    %116 = arith.addf %114, %115 : vector<8x32xf32>
    %117 = math.tanh %116 : vector<8x32xf32>
    %118 = arith.mulf %111, %117 : vector<8x32xf32>
    %c8 = arith.constant 8 : index
    %c0_27 = arith.constant 0 : index
    %119 = vector.load %arg10[%c8, %c0_27] : memref<64x32xf32, #tpu.memory_space<vmem>>, vector<8x32xf32>
    tpu.vector_store %arg10[%c8, %c0_27], %118 {strides = array<i32>} : memref<64x32xf32, #tpu.memory_space<vmem>>, vector<8x32xf32>,
    %120 = tpu.concatenate %98, %118 in 0 : vector<8x32xf32>, vector<8x32xf32> -> vector<16x32xf32>
    %121 = arith.truncf %120 : vector<16x32xf32> to vector<16x32xbf16>
    %c0_28 = arith.constant 0 : index
    %c0_29 = arith.constant 0 : index
    %122 = vector.load %arg2[%c0_28, %c0_29] : memref<32x384xbf16, #tpu.memory_space<vmem>>, vector<32x384xbf16>
    %cst_30 = arith.constant dense<0.000000e+00> : vector<16x384xf32>
    %123 = tpu.matmul %121, %122, %cst_30 {dimension_numbers = #tpu.dot_dimension_numbers<[1], [0], [0], [1], [0, 0, 1, 1], [], []>} : vector<16x32xbf16>, vector<32x384xbf16>, vector<16x384xf32> -> vector<16x384xf32>
    %124 = vector.extract_strided_slice %6 {offsets = [24, 0], sizes = [8, 128], strides = [1, 1]} : vector<64x128xf32> to vector<8x128xf32>
    %125 = vector.extract_strided_slice %123 {offsets = [0, 0], sizes = [8, 128], strides = [1, 1]} : vector<16x384xf32> to vector<8x128xf32>
    %126 = arith.addf %124, %125 : vector<8x128xf32>
    %127 = arith.negf %126 : vector<8x128xf32>
    %128 = math.exp %127 : vector<8x128xf32>
    %cst_31 = arith.constant 1.000000e+00 : f32
    %129 = vector.broadcast %cst_31 : f32 to vector<8x128xf32>
    %130 = arith.addf %129, %128 : vector<8x128xf32>
    %131 = arith.divf %129, %130 : vector<8x128xf32>
    %132 = vector.extract_strided_slice %131 {offsets = [0, 0], sizes = [8, 32], strides = [1, 1]} : vector<8x128xf32> to vector<8x32xf32>
    %133 = vector.extract_strided_slice %131 {offsets = [0, 32], sizes = [8, 32], strides = [1, 1]} : vector<8x128xf32> to vector<8x32xf32>
    %134 = vector.extract_strided_slice %131 {offsets = [0, 96], sizes = [8, 32], strides = [1, 1]} : vector<8x128xf32> to vector<8x32xf32>
    %135 = vector.extract_strided_slice %126 {offsets = [0, 64], sizes = [8, 32], strides = [1, 1]} : vector<8x128xf32> to vector<8x32xf32>
    %136 = math.tanh %135 : vector<8x32xf32>
    %137 = arith.mulf %133, %96 : vector<8x32xf32>
    %138 = arith.mulf %132, %136 : vector<8x32xf32>
    %139 = arith.addf %137, %138 : vector<8x32xf32>
    %140 = math.tanh %139 : vector<8x32xf32>
    %141 = arith.mulf %134, %140 : vector<8x32xf32>
    %142 = vector.extract_strided_slice %123 {offsets = [0, 128], sizes = [8, 128], strides = [1, 1]} : vector<16x384xf32> to vector<8x128xf32>
    %143 = vector.extract_strided_slice %123 {offsets = [8, 256], sizes = [8, 128], strides = [1, 1]} : vector<16x384xf32> to vector<8x128xf32>
    %144 = arith.addf %142, %143 : vector<8x128xf32>
    %145 = vector.broadcast %7 : vector<1x128xf32> to vector<8x128xf32>
    %146 = arith.addf %144, %145 : vector<8x128xf32>
    %147 = arith.negf %146 : vector<8x128xf32>
    %148 = math.exp %147 : vector<8x128xf32>
    %cst_32 = arith.constant 1.000000e+00 : f32
    %149 = vector.broadcast %cst_32 : f32 to vector<8x128xf32>
    %150 = arith.addf %149, %148 : vector<8x128xf32>
    %151 = arith.divf %149, %150 : vector<8x128xf32>
    %152 = vector.extract_strided_slice %151 {offsets = [0, 0], sizes = [8, 32], strides = [1, 1]} : vector<8x128xf32> to vector<8x32xf32>
    %153 = vector.extract_strided_slice %151 {offsets = [0, 32], sizes = [8, 32], strides = [1, 1]} : vector<8x128xf32> to vector<8x32xf32>
    %154 = vector.extract_strided_slice %151 {offsets = [0, 96], sizes = [8, 32], strides = [1, 1]} : vector<8x128xf32> to vector<8x32xf32>
    %155 = vector.extract_strided_slice %146 {offsets = [0, 64], sizes = [8, 32], strides = [1, 1]} : vector<8x128xf32> to vector<8x32xf32>
    %156 = math.tanh %155 : vector<8x32xf32>
    %157 = arith.mulf %153, %116 : vector<8x32xf32>
    %158 = arith.mulf %152, %156 : vector<8x32xf32>
    %159 = arith.addf %157, %158 : vector<8x32xf32>
    %160 = math.tanh %159 : vector<8x32xf32>
    %161 = arith.mulf %154, %160 : vector<8x32xf32>
    %c16 = arith.constant 16 : index
    %c0_33 = arith.constant 0 : index
    %162 = vector.load %arg10[%c16, %c0_33] : memref<64x32xf32, #tpu.memory_space<vmem>>, vector<8x32xf32>
    tpu.vector_store %arg10[%c16, %c0_33], %161 {strides = array<i32>} : memref<64x32xf32, #tpu.memory_space<vmem>>, vector<8x32xf32>,
    %163 = tpu.concatenate %141, %161 in 0 : vector<8x32xf32>, vector<8x32xf32> -> vector<16x32xf32>
    %164 = arith.truncf %163 : vector<16x32xf32> to vector<16x32xbf16>
    %c0_34 = arith.constant 0 : index
    %c0_35 = arith.constant 0 : index
    %165 = vector.load %arg2[%c0_34, %c0_35] : memref<32x384xbf16, #tpu.memory_space<vmem>>, vector<32x384xbf16>
    %cst_36 = arith.constant dense<0.000000e+00> : vector<16x384xf32>
    %166 = tpu.matmul %164, %165, %cst_36 {dimension_numbers = #tpu.dot_dimension_numbers<[1], [0], [0], [1], [0, 0, 1, 1], [], []>} : vector<16x32xbf16>, vector<32x384xbf16>, vector<16x384xf32> -> vector<16x384xf32>
    %167 = vector.extract_strided_slice %6 {offsets = [32, 0], sizes = [8, 128], strides = [1, 1]} : vector<64x128xf32> to vector<8x128xf32>
    %168 = vector.extract_strided_slice %166 {offsets = [0, 0], sizes = [8, 128], strides = [1, 1]} : vector<16x384xf32> to vector<8x128xf32>
    %169 = arith.addf %167, %168 : vector<8x128xf32>
    %170 = arith.negf %169 : vector<8x128xf32>
    %171 = math.exp %170 : vector<8x128xf32>
    %cst_37 = arith.constant 1.000000e+00 : f32
    %172 = vector.broadcast %cst_37 : f32 to vector<8x128xf32>
    %173 = arith.addf %172, %171 : vector<8x128xf32>
    %174 = arith.divf %172, %173 : vector<8x128xf32>
    %175 = vector.extract_strided_slice %174 {offsets = [0, 0], sizes = [8, 32], strides = [1, 1]} : vector<8x128xf32> to vector<8x32xf32>
    %176 = vector.extract_strided_slice %174 {offsets = [0, 32], sizes = [8, 32], strides = [1, 1]} : vector<8x128xf32> to vector<8x32xf32>
    %177 = vector.extract_strided_slice %174 {offsets = [0, 96], sizes = [8, 32], strides = [1, 1]} : vector<8x128xf32> to vector<8x32xf32>
    %178 = vector.extract_strided_slice %169 {offsets = [0, 64], sizes = [8, 32], strides = [1, 1]} : vector<8x128xf32> to vector<8x32xf32>
    %179 = math.tanh %178 : vector<8x32xf32>
    %180 = arith.mulf %176, %139 : vector<8x32xf32>
    %181 = arith.mulf %175, %179 : vector<8x32xf32>
    %182 = arith.addf %180, %181 : vector<8x32xf32>
    %183 = math.tanh %182 : vector<8x32xf32>
    %184 = arith.mulf %177, %183 : vector<8x32xf32>
    %185 = vector.extract_strided_slice %166 {offsets = [0, 128], sizes = [8, 128], strides = [1, 1]} : vector<16x384xf32> to vector<8x128xf32>
    %186 = vector.extract_strided_slice %166 {offsets = [8, 256], sizes = [8, 128], strides = [1, 1]} : vector<16x384xf32> to vector<8x128xf32>
    %187 = arith.addf %185, %186 : vector<8x128xf32>
    %188 = vector.broadcast %7 : vector<1x128xf32> to vector<8x128xf32>
    %189 = arith.addf %187, %188 : vector<8x128xf32>
    %190 = arith.negf %189 : vector<8x128xf32>
    %191 = math.exp %190 : vector<8x128xf32>
    %cst_38 = arith.constant 1.000000e+00 : f32
    %192 = vector.broadcast %cst_38 : f32 to vector<8x128xf32>
    %193 = arith.addf %192, %191 : vector<8x128xf32>
    %194 = arith.divf %192, %193 : vector<8x128xf32>
    %195 = vector.extract_strided_slice %194 {offsets = [0, 0], sizes = [8, 32], strides = [1, 1]} : vector<8x128xf32> to vector<8x32xf32>
    %196 = vector.extract_strided_slice %194 {offsets = [0, 32], sizes = [8, 32], strides = [1, 1]} : vector<8x128xf32> to vector<8x32xf32>
    %197 = vector.extract_strided_slice %194 {offsets = [0, 96], sizes = [8, 32], strides = [1, 1]} : vector<8x128xf32> to vector<8x32xf32>
    %198 = vector.extract_strided_slice %189 {offsets = [0, 64], sizes = [8, 32], strides = [1, 1]} : vector<8x128xf32> to vector<8x32xf32>
    %199 = math.tanh %198 : vector<8x32xf32>
    %200 = arith.mulf %196, %159 : vector<8x32xf32>
    %201 = arith.mulf %195, %199 : vector<8x32xf32>
    %202 = arith.addf %200, %201 : vector<8x32xf32>
    %203 = math.tanh %202 : vector<8x32xf32>
    %204 = arith.mulf %197, %203 : vector<8x32xf32>
    %c24 = arith.constant 24 : index
    %c0_39 = arith.constant 0 : index
    %205 = vector.load %arg10[%c24, %c0_39] : memref<64x32xf32, #tpu.memory_space<vmem>>, vector<8x32xf32>
    tpu.vector_store %arg10[%c24, %c0_39], %204 {strides = array<i32>} : memref<64x32xf32, #tpu.memory_space<vmem>>, vector<8x32xf32>,
    %206 = tpu.concatenate %184, %204 in 0 : vector<8x32xf32>, vector<8x32xf32> -> vector<16x32xf32>
    %207 = arith.truncf %206 : vector<16x32xf32> to vector<16x32xbf16>
    %c0_40 = arith.constant 0 : index
    %c0_41 = arith.constant 0 : index
    %208 = vector.load %arg2[%c0_40, %c0_41] : memref<32x384xbf16, #tpu.memory_space<vmem>>, vector<32x384xbf16>
    %cst_42 = arith.constant dense<0.000000e+00> : vector<16x384xf32>
    %209 = tpu.matmul %207, %208, %cst_42 {dimension_numbers = #tpu.dot_dimension_numbers<[1], [0], [0], [1], [0, 0, 1, 1], [], []>} : vector<16x32xbf16>, vector<32x384xbf16>, vector<16x384xf32> -> vector<16x384xf32>
    %210 = vector.extract_strided_slice %6 {offsets = [40, 0], sizes = [8, 128], strides = [1, 1]} : vector<64x128xf32> to vector<8x128xf32>
    %211 = vector.extract_strided_slice %209 {offsets = [0, 0], sizes = [8, 128], strides = [1, 1]} : vector<16x384xf32> to vector<8x128xf32>
    %212 = arith.addf %210, %211 : vector<8x128xf32>
    %213 = arith.negf %212 : vector<8x128xf32>
    %214 = math.exp %213 : vector<8x128xf32>
    %cst_43 = arith.constant 1.000000e+00 : f32
    %215 = vector.broadcast %cst_43 : f32 to vector<8x128xf32>
    %216 = arith.addf %215, %214 : vector<8x128xf32>
    %217 = arith.divf %215, %216 : vector<8x128xf32>
    %218 = vector.extract_strided_slice %217 {offsets = [0, 0], sizes = [8, 32], strides = [1, 1]} : vector<8x128xf32> to vector<8x32xf32>
    %219 = vector.extract_strided_slice %217 {offsets = [0, 32], sizes = [8, 32], strides = [1, 1]} : vector<8x128xf32> to vector<8x32xf32>
    %220 = vector.extract_strided_slice %217 {offsets = [0, 96], sizes = [8, 32], strides = [1, 1]} : vector<8x128xf32> to vector<8x32xf32>
    %221 = vector.extract_strided_slice %212 {offsets = [0, 64], sizes = [8, 32], strides = [1, 1]} : vector<8x128xf32> to vector<8x32xf32>
    %222 = math.tanh %221 : vector<8x32xf32>
    %223 = arith.mulf %219, %182 : vector<8x32xf32>
    %224 = arith.mulf %218, %222 : vector<8x32xf32>
    %225 = arith.addf %223, %224 : vector<8x32xf32>
    %226 = math.tanh %225 : vector<8x32xf32>
    %227 = arith.mulf %220, %226 : vector<8x32xf32>
    %228 = vector.extract_strided_slice %209 {offsets = [0, 128], sizes = [8, 128], strides = [1, 1]} : vector<16x384xf32> to vector<8x128xf32>
    %229 = vector.extract_strided_slice %209 {offsets = [8, 256], sizes = [8, 128], strides = [1, 1]} : vector<16x384xf32> to vector<8x128xf32>
    %230 = arith.addf %228, %229 : vector<8x128xf32>
    %231 = vector.broadcast %7 : vector<1x128xf32> to vector<8x128xf32>
    %232 = arith.addf %230, %231 : vector<8x128xf32>
    %233 = arith.negf %232 : vector<8x128xf32>
    %234 = math.exp %233 : vector<8x128xf32>
    %cst_44 = arith.constant 1.000000e+00 : f32
    %235 = vector.broadcast %cst_44 : f32 to vector<8x128xf32>
    %236 = arith.addf %235, %234 : vector<8x128xf32>
    %237 = arith.divf %235, %236 : vector<8x128xf32>
    %238 = vector.extract_strided_slice %237 {offsets = [0, 0], sizes = [8, 32], strides = [1, 1]} : vector<8x128xf32> to vector<8x32xf32>
    %239 = vector.extract_strided_slice %237 {offsets = [0, 32], sizes = [8, 32], strides = [1, 1]} : vector<8x128xf32> to vector<8x32xf32>
    %240 = vector.extract_strided_slice %237 {offsets = [0, 96], sizes = [8, 32], strides = [1, 1]} : vector<8x128xf32> to vector<8x32xf32>
    %241 = vector.extract_strided_slice %232 {offsets = [0, 64], sizes = [8, 32], strides = [1, 1]} : vector<8x128xf32> to vector<8x32xf32>
    %242 = math.tanh %241 : vector<8x32xf32>
    %243 = arith.mulf %239, %202 : vector<8x32xf32>
    %244 = arith.mulf %238, %242 : vector<8x32xf32>
    %245 = arith.addf %243, %244 : vector<8x32xf32>
    %246 = math.tanh %245 : vector<8x32xf32>
    %247 = arith.mulf %240, %246 : vector<8x32xf32>
    %c32 = arith.constant 32 : index
    %c0_45 = arith.constant 0 : index
    %248 = vector.load %arg10[%c32, %c0_45] : memref<64x32xf32, #tpu.memory_space<vmem>>, vector<8x32xf32>
    tpu.vector_store %arg10[%c32, %c0_45], %247 {strides = array<i32>} : memref<64x32xf32, #tpu.memory_space<vmem>>, vector<8x32xf32>,
    %249 = tpu.concatenate %227, %247 in 0 : vector<8x32xf32>, vector<8x32xf32> -> vector<16x32xf32>
    %250 = arith.truncf %249 : vector<16x32xf32> to vector<16x32xbf16>
    %c0_46 = arith.constant 0 : index
    %c0_47 = arith.constant 0 : index
    %251 = vector.load %arg2[%c0_46, %c0_47] : memref<32x384xbf16, #tpu.memory_space<vmem>>, vector<32x384xbf16>
    %cst_48 = arith.constant dense<0.000000e+00> : vector<16x384xf32>
    %252 = tpu.matmul %250, %251, %cst_48 {dimension_numbers = #tpu.dot_dimension_numbers<[1], [0], [0], [1], [0, 0, 1, 1], [], []>} : vector<16x32xbf16>, vector<32x384xbf16>, vector<16x384xf32> -> vector<16x384xf32>
    %253 = vector.extract_strided_slice %6 {offsets = [48, 0], sizes = [8, 128], strides = [1, 1]} : vector<64x128xf32> to vector<8x128xf32>
    %254 = vector.extract_strided_slice %252 {offsets = [0, 0], sizes = [8, 128], strides = [1, 1]} : vector<16x384xf32> to vector<8x128xf32>
    %255 = arith.addf %253, %254 : vector<8x128xf32>
    %256 = arith.negf %255 : vector<8x128xf32>
    %257 = math.exp %256 : vector<8x128xf32>
    %cst_49 = arith.constant 1.000000e+00 : f32
    %258 = vector.broadcast %cst_49 : f32 to vector<8x128xf32>
    %259 = arith.addf %258, %257 : vector<8x128xf32>
    %260 = arith.divf %258, %259 : vector<8x128xf32>
    %261 = vector.extract_strided_slice %260 {offsets = [0, 0], sizes = [8, 32], strides = [1, 1]} : vector<8x128xf32> to vector<8x32xf32>
    %262 = vector.extract_strided_slice %260 {offsets = [0, 32], sizes = [8, 32], strides = [1, 1]} : vector<8x128xf32> to vector<8x32xf32>
    %263 = vector.extract_strided_slice %260 {offsets = [0, 96], sizes = [8, 32], strides = [1, 1]} : vector<8x128xf32> to vector<8x32xf32>
    %264 = vector.extract_strided_slice %255 {offsets = [0, 64], sizes = [8, 32], strides = [1, 1]} : vector<8x128xf32> to vector<8x32xf32>
    %265 = math.tanh %264 : vector<8x32xf32>
    %266 = arith.mulf %262, %225 : vector<8x32xf32>
    %267 = arith.mulf %261, %265 : vector<8x32xf32>
    %268 = arith.addf %266, %267 : vector<8x32xf32>
    %269 = math.tanh %268 : vector<8x32xf32>
    %270 = arith.mulf %263, %269 : vector<8x32xf32>
    %271 = vector.extract_strided_slice %252 {offsets = [0, 128], sizes = [8, 128], strides = [1, 1]} : vector<16x384xf32> to vector<8x128xf32>
    %272 = vector.extract_strided_slice %252 {offsets = [8, 256], sizes = [8, 128], strides = [1, 1]} : vector<16x384xf32> to vector<8x128xf32>
    %273 = arith.addf %271, %272 : vector<8x128xf32>
    %274 = vector.broadcast %7 : vector<1x128xf32> to vector<8x128xf32>
    %275 = arith.addf %273, %274 : vector<8x128xf32>
    %276 = arith.negf %275 : vector<8x128xf32>
    %277 = math.exp %276 : vector<8x128xf32>
    %cst_50 = arith.constant 1.000000e+00 : f32
    %278 = vector.broadcast %cst_50 : f32 to vector<8x128xf32>
    %279 = arith.addf %278, %277 : vector<8x128xf32>
    %280 = arith.divf %278, %279 : vector<8x128xf32>
    %281 = vector.extract_strided_slice %280 {offsets = [0, 0], sizes = [8, 32], strides = [1, 1]} : vector<8x128xf32> to vector<8x32xf32>
    %282 = vector.extract_strided_slice %280 {offsets = [0, 32], sizes = [8, 32], strides = [1, 1]} : vector<8x128xf32> to vector<8x32xf32>
    %283 = vector.extract_strided_slice %280 {offsets = [0, 96], sizes = [8, 32], strides = [1, 1]} : vector<8x128xf32> to vector<8x32xf32>
    %284 = vector.extract_strided_slice %275 {offsets = [0, 64], sizes = [8, 32], strides = [1, 1]} : vector<8x128xf32> to vector<8x32xf32>
    %285 = math.tanh %284 : vector<8x32xf32>
    %286 = arith.mulf %282, %245 : vector<8x32xf32>
    %287 = arith.mulf %281, %285 : vector<8x32xf32>
    %288 = arith.addf %286, %287 : vector<8x32xf32>
    %289 = math.tanh %288 : vector<8x32xf32>
    %290 = arith.mulf %283, %289 : vector<8x32xf32>
    %c40 = arith.constant 40 : index
    %c0_51 = arith.constant 0 : index
    %291 = vector.load %arg10[%c40, %c0_51] : memref<64x32xf32, #tpu.memory_space<vmem>>, vector<8x32xf32>
    tpu.vector_store %arg10[%c40, %c0_51], %290 {strides = array<i32>} : memref<64x32xf32, #tpu.memory_space<vmem>>, vector<8x32xf32>,
    %292 = tpu.concatenate %270, %290 in 0 : vector<8x32xf32>, vector<8x32xf32> -> vector<16x32xf32>
    %293 = arith.truncf %292 : vector<16x32xf32> to vector<16x32xbf16>
    %c0_52 = arith.constant 0 : index
    %c0_53 = arith.constant 0 : index
    %294 = vector.load %arg2[%c0_52, %c0_53] : memref<32x384xbf16, #tpu.memory_space<vmem>>, vector<32x384xbf16>
    %cst_54 = arith.constant dense<0.000000e+00> : vector<16x384xf32>
    %295 = tpu.matmul %293, %294, %cst_54 {dimension_numbers = #tpu.dot_dimension_numbers<[1], [0], [0], [1], [0, 0, 1, 1], [], []>} : vector<16x32xbf16>, vector<32x384xbf16>, vector<16x384xf32> -> vector<16x384xf32>
    %296 = vector.extract_strided_slice %6 {offsets = [56, 0], sizes = [8, 128], strides = [1, 1]} : vector<64x128xf32> to vector<8x128xf32>
    %297 = vector.extract_strided_slice %295 {offsets = [0, 0], sizes = [8, 128], strides = [1, 1]} : vector<16x384xf32> to vector<8x128xf32>
    %298 = arith.addf %296, %297 : vector<8x128xf32>
    %299 = arith.negf %298 : vector<8x128xf32>
    %300 = math.exp %299 : vector<8x128xf32>
    %cst_55 = arith.constant 1.000000e+00 : f32
    %301 = vector.broadcast %cst_55 : f32 to vector<8x128xf32>
    %302 = arith.addf %301, %300 : vector<8x128xf32>
    %303 = arith.divf %301, %302 : vector<8x128xf32>
    %304 = vector.extract_strided_slice %303 {offsets = [0, 0], sizes = [8, 32], strides = [1, 1]} : vector<8x128xf32> to vector<8x32xf32>
    %305 = vector.extract_strided_slice %303 {offsets = [0, 32], sizes = [8, 32], strides = [1, 1]} : vector<8x128xf32> to vector<8x32xf32>
    %306 = vector.extract_strided_slice %303 {offsets = [0, 96], sizes = [8, 32], strides = [1, 1]} : vector<8x128xf32> to vector<8x32xf32>
    %307 = vector.extract_strided_slice %298 {offsets = [0, 64], sizes = [8, 32], strides = [1, 1]} : vector<8x128xf32> to vector<8x32xf32>
    %308 = math.tanh %307 : vector<8x32xf32>
    %309 = arith.mulf %305, %268 : vector<8x32xf32>
    %310 = arith.mulf %304, %308 : vector<8x32xf32>
    %311 = arith.addf %309, %310 : vector<8x32xf32>
    %312 = math.tanh %311 : vector<8x32xf32>
    %313 = arith.mulf %306, %312 : vector<8x32xf32>
    %314 = vector.extract_strided_slice %295 {offsets = [0, 128], sizes = [8, 128], strides = [1, 1]} : vector<16x384xf32> to vector<8x128xf32>
    %315 = vector.extract_strided_slice %295 {offsets = [8, 256], sizes = [8, 128], strides = [1, 1]} : vector<16x384xf32> to vector<8x128xf32>
    %316 = arith.addf %314, %315 : vector<8x128xf32>
    %317 = vector.broadcast %7 : vector<1x128xf32> to vector<8x128xf32>
    %318 = arith.addf %316, %317 : vector<8x128xf32>
    %319 = arith.negf %318 : vector<8x128xf32>
    %320 = math.exp %319 : vector<8x128xf32>
    %cst_56 = arith.constant 1.000000e+00 : f32
    %321 = vector.broadcast %cst_56 : f32 to vector<8x128xf32>
    %322 = arith.addf %321, %320 : vector<8x128xf32>
    %323 = arith.divf %321, %322 : vector<8x128xf32>
    %324 = vector.extract_strided_slice %323 {offsets = [0, 0], sizes = [8, 32], strides = [1, 1]} : vector<8x128xf32> to vector<8x32xf32>
    %325 = vector.extract_strided_slice %323 {offsets = [0, 32], sizes = [8, 32], strides = [1, 1]} : vector<8x128xf32> to vector<8x32xf32>
    %326 = vector.extract_strided_slice %323 {offsets = [0, 96], sizes = [8, 32], strides = [1, 1]} : vector<8x128xf32> to vector<8x32xf32>
    %327 = vector.extract_strided_slice %318 {offsets = [0, 64], sizes = [8, 32], strides = [1, 1]} : vector<8x128xf32> to vector<8x32xf32>
    %328 = math.tanh %327 : vector<8x32xf32>
    %329 = arith.mulf %325, %288 : vector<8x32xf32>
    %330 = arith.mulf %324, %328 : vector<8x32xf32>
    %331 = arith.addf %329, %330 : vector<8x32xf32>
    %332 = math.tanh %331 : vector<8x32xf32>
    %333 = arith.mulf %326, %332 : vector<8x32xf32>
    %c48 = arith.constant 48 : index
    %c0_57 = arith.constant 0 : index
    %334 = vector.load %arg10[%c48, %c0_57] : memref<64x32xf32, #tpu.memory_space<vmem>>, vector<8x32xf32>
    tpu.vector_store %arg10[%c48, %c0_57], %333 {strides = array<i32>} : memref<64x32xf32, #tpu.memory_space<vmem>>, vector<8x32xf32>,
    %335 = tpu.concatenate %313, %333 in 0 : vector<8x32xf32>, vector<8x32xf32> -> vector<16x32xf32>
    %336 = arith.truncf %335 : vector<16x32xf32> to vector<16x32xbf16>
    %c0_58 = arith.constant 0 : index
    %c0_59 = arith.constant 0 : index
    %337 = vector.load %arg2[%c0_58, %c0_59] : memref<32x384xbf16, #tpu.memory_space<vmem>>, vector<32x384xbf16>
    %cst_60 = arith.constant dense<0.000000e+00> : vector<16x384xf32>
    %338 = tpu.matmul %336, %337, %cst_60 {dimension_numbers = #tpu.dot_dimension_numbers<[1], [0], [0], [1], [0, 0, 1, 1], [], []>} : vector<16x32xbf16>, vector<32x384xbf16>, vector<16x384xf32> -> vector<16x384xf32>
    %339 = vector.extract_strided_slice %338 {offsets = [0, 128], sizes = [8, 128], strides = [1, 1]} : vector<16x384xf32> to vector<8x128xf32>
    %340 = vector.extract_strided_slice %338 {offsets = [8, 256], sizes = [8, 128], strides = [1, 1]} : vector<16x384xf32> to vector<8x128xf32>
    %341 = arith.addf %339, %340 : vector<8x128xf32>
    %342 = vector.broadcast %7 : vector<1x128xf32> to vector<8x128xf32>
    %343 = arith.addf %341, %342 : vector<8x128xf32>
    %344 = arith.negf %343 : vector<8x128xf32>
    %345 = math.exp %344 : vector<8x128xf32>
    %cst_61 = arith.constant 1.000000e+00 : f32
    %346 = vector.broadcast %cst_61 : f32 to vector<8x128xf32>
    %347 = arith.addf %346, %345 : vector<8x128xf32>
    %348 = arith.divf %346, %347 : vector<8x128xf32>
    %349 = vector.extract_strided_slice %348 {offsets = [0, 0], sizes = [8, 32], strides = [1, 1]} : vector<8x128xf32> to vector<8x32xf32>
    %350 = vector.extract_strided_slice %348 {offsets = [0, 32], sizes = [8, 32], strides = [1, 1]} : vector<8x128xf32> to vector<8x32xf32>
    %351 = vector.extract_strided_slice %348 {offsets = [0, 96], sizes = [8, 32], strides = [1, 1]} : vector<8x128xf32> to vector<8x32xf32>
    %352 = vector.extract_strided_slice %343 {offsets = [0, 64], sizes = [8, 32], strides = [1, 1]} : vector<8x128xf32> to vector<8x32xf32>
    %353 = math.tanh %352 : vector<8x32xf32>
    %354 = arith.mulf %350, %331 : vector<8x32xf32>
    %355 = arith.mulf %349, %353 : vector<8x32xf32>
    %356 = arith.addf %354, %355 : vector<8x32xf32>
    %357 = math.tanh %356 : vector<8x32xf32>
    %358 = arith.mulf %351, %357 : vector<8x32xf32>
    %c56 = arith.constant 56 : index
    %c0_62 = arith.constant 0 : index
    %359 = vector.load %arg10[%c56, %c0_62] : memref<64x32xf32, #tpu.memory_space<vmem>>, vector<8x32xf32>
    tpu.vector_store %arg10[%c56, %c0_62], %358 {strides = array<i32>} : memref<64x32xf32, #tpu.memory_space<vmem>>, vector<8x32xf32>,
    %c0_63 = arith.constant 0 : index
    %c0_64 = arith.constant 0 : index
    %c0_65 = arith.constant 0 : index
    %360 = vector.load %arg8[%c0_63, %c0_64, %c0_65] : memref<2x8x32xf32, #tpu.memory_space<vmem>>, vector<1x8x32xf32>
    %361 = vector.shape_cast %360 : vector<1x8x32xf32> to vector<8x32xf32>
    %362 = vector.shape_cast %313 : vector<8x32xf32> to vector<1x8x32xf32>
    tpu.vector_store %arg8[%c0_63, %c0_64, %c0_65], %362 {strides = array<i32>} : memref<2x8x32xf32, #tpu.memory_space<vmem>>, vector<1x8x32xf32>,
    %c0_66 = arith.constant 0 : index
    %c0_67 = arith.constant 0 : index
    %c0_68 = arith.constant 0 : index
    %363 = vector.load %arg9[%c0_66, %c0_67, %c0_68] : memref<2x8x32xf32, #tpu.memory_space<vmem>>, vector<1x8x32xf32>
    %364 = vector.shape_cast %363 : vector<1x8x32xf32> to vector<8x32xf32>
    %365 = vector.shape_cast %311 : vector<8x32xf32> to vector<1x8x32xf32>
    tpu.vector_store %arg9[%c0_66, %c0_67, %c0_68], %365 {strides = array<i32>} : memref<2x8x32xf32, #tpu.memory_space<vmem>>, vector<1x8x32xf32>,
    %c1 = arith.constant 1 : index
    %c0_69 = arith.constant 0 : index
    %c0_70 = arith.constant 0 : index
    %366 = vector.load %arg8[%c1, %c0_69, %c0_70] : memref<2x8x32xf32, #tpu.memory_space<vmem>>, vector<1x8x32xf32>
    %367 = vector.shape_cast %366 : vector<1x8x32xf32> to vector<8x32xf32>
    %368 = vector.shape_cast %358 : vector<8x32xf32> to vector<1x8x32xf32>
    tpu.vector_store %arg8[%c1, %c0_69, %c0_70], %368 {strides = array<i32>} : memref<2x8x32xf32, #tpu.memory_space<vmem>>, vector<1x8x32xf32>,
    %c1_71 = arith.constant 1 : index
    %c0_72 = arith.constant 0 : index
    %c0_73 = arith.constant 0 : index
    %369 = vector.load %arg9[%c1_71, %c0_72, %c0_73] : memref<2x8x32xf32, #tpu.memory_space<vmem>>, vector<1x8x32xf32>
    %370 = vector.shape_cast %369 : vector<1x8x32xf32> to vector<8x32xf32>
    %371 = vector.shape_cast %356 : vector<8x32xf32> to vector<1x8x32xf32>
    tpu.vector_store %arg9[%c1_71, %c0_72, %c0_73], %371 {strides = array<i32>} : memref<2x8x32xf32, #tpu.memory_space<vmem>>, vector<1x8x32xf32>,
    %c0_74 = arith.constant 0 : index
    %c0_75 = arith.constant 0 : index
    %372 = vector.load %arg10[%c0_74, %c0_75] : memref<64x32xf32, #tpu.memory_space<vmem>>, vector<64x32xf32>
    %373 = arith.truncf %372 : vector<64x32xf32> to vector<64x32xbf16>
    %c0_76 = arith.constant 0 : index
    %c0_77 = arith.constant 0 : index
    %374 = vector.load %arg5[%c0_76, %c0_77] : memref<32x32xbf16, #tpu.memory_space<vmem>>, vector<32x32xbf16>
    %cst_78 = arith.constant dense<0.000000e+00> : vector<64x32xf32>
    %375 = tpu.matmul %373, %374, %cst_78 {dimension_numbers = #tpu.dot_dimension_numbers<[1], [0], [0], [1], [0, 0, 1, 1], [], []>} : vector<64x32xbf16>, vector<32x32xbf16>, vector<64x32xf32> -> vector<64x32xf32>
    %c0_79 = arith.constant 0 : index
    %c0_80 = arith.constant 0 : index
    %376 = vector.load %arg6[%c0_79, %c0_80] : memref<1x32xf32, #tpu.memory_space<vmem>>, vector<1x32xf32>
    %377 = vector.broadcast %376 : vector<1x32xf32> to vector<64x32xf32>
    %378 = arith.addf %375, %377 : vector<64x32xf32>
    %c0_81 = arith.constant 0 : index
    %c0_82 = arith.constant 0 : index
    %379 = vector.load %arg7[%c0_81, %c0_82] : memref<64x32xf32, #tpu.memory_space<vmem>>, vector<64x32xf32>
    tpu.vector_store %arg7[%c0_81, %c0_82], %378 {strides = array<i32>} : memref<64x32xf32, #tpu.memory_space<vmem>>, vector<64x32xf32>,
    return
  }
}

</mosaic_0001>

<bundles_post_ra>
// kernel: lstm_encoder_forward.1
= control target key start
LH: loop header
LB: loop body
LE: loop exit
PB: predicated region body
PF: predicated region fallthrough
CT: control target
= control target key end

     0   :  { %15 = vsyncpa [#allocation4], 0  ;;  %s2910_s0 = inlined_call_operand.hbm [shape: f32[64,32], index: 0, kind: input, shape index: {}]   ;;  %s2911_s1 = inlined_call_operand.hbm [shape: bf16[32,128], index: 1, kind: input, shape index: {}]   ;;  %s2912_s2 = inlined_call_operand.hbm [shape: bf16[32,384], index: 2, kind: input, shape index: {}]   ;;  %s2913_s3 = inlined_call_operand.vmem [shape: f32[1,128], index: 3, kind: input, shape index: {}]   ;;  %s2914_s4 = inlined_call_operand.vmem [shape: f32[1,128], index: 4, kind: input, shape index: {}]   ;;  %s2915_s5 = inlined_call_operand.vmem [shape: bf16[32,32], index: 5, kind: input, shape index: {}]   ;;  %s2916_s6 = inlined_call_operand.vmem [shape: f32[1,32], index: 6, kind: input, shape index: {}]   ;;  %s2917_s7 = inlined_call_operand.hbm [shape: f32[64,32], index: 7, kind: output, shape index: {0}]   ;;  %s2918_s8 = inlined_call_operand.hbm [shape: f32[2,8,32], index: 8, kind: output, shape index: {1}]   ;;  %s2919_s9 = inlined_call_operand.hbm [shape: f32[2,8,32], index: 9, kind: output, shape index: {2}]  }
   0x1   :  { %16 = vsyncpa [#allocation7], 0 }
   0x2   :  { %17 = vsyncpa [#allocation5], 0 }
   0x3   :  { %18 = vsyncpa [#allocation11], 0  ;;  %s2432_s30 = smov [#allocation6]   ;;  %s2292_s13 = scalar_lea.hbm %s2911_s1, 256 }
   0x4   :  { %s36_s10 = sshll.u32 %s2432_s30, 4  ;;  %p2293_p0 = scmp.ne.s32.totalorder %s2911_s1, %s2292_s13  ;;  %s37_s10 = int_to_ptr.vmem [resolvable:$true] %s36_s10 }
   0x5   :  { %p2296_p1 = scmp.lt.u32.totalorder %s2292_s13, %s2911_s1 }
   0x7   :  { %p2298_p2 = pnand %p2296_p1, %p2293_p0 }
   0x9   :  { %2301 = shalt.err (!%p2298_p2)
}
   0xa   :  { %s2302_s18 = scalar_lea.vmem %s37_s10, 256  ;;  %p2307_p4 = scmp.lt.s32.totalorder %s37_s10, %s37_s10 }
   0xb   :  { %p2303_p3 = scmp.ne.s32.totalorder %s37_s10, %s2302_s18  ;;  %p2308_p5 = scmp.lt.s32.totalorder %s2302_s18, %s2302_s18 }
   0xd   :  { %p2309_p6 = por %p2308_p5, %p2307_p4 }
   0xf   :  { %p2310_p7 = pnand %p2309_p6, %p2303_p3 }
  0x11   :  { %2313 = shalt.err (!%p2310_p7)
}
  0x12   :  { %s2433_s19 = smov 64   ;;  %s2434_s20 = smov 4  }
  0x13   :  { %42 = dma.hbm_to_vmem [thread:$0]  %s2911_s1, 256, %s37_s10, [#allocation7], %s2433_s19, %s2433_s19, %s2434_s20  }
  0x14   :  { %s2435_s23 = smov [#allocation3]   ;;  %s2314_s27 = scalar_lea.hbm %s2910_s0, 1024 }
  0x15   :  { %s24_s24 = sshll.u32 %s2435_s23, 4  ;;  %p2315_p8 = scmp.ne.s32.totalorder %s2910_s0, %s2314_s27  ;;  %s25_s24 = int_to_ptr.vmem [resolvable:$true] %s24_s24 }
  0x16   :  { %p2318_p9 = scmp.lt.u32.totalorder %s2314_s27, %s2910_s0 }
  0x18   :  { %p2320_p10 = pnand %p2318_p9, %p2315_p8 }
  0x1a   :  { %2323 = shalt.err (!%p2320_p10)
}
  0x1b   :  { %s2324_s12 = scalar_lea.vmem %s25_s24, 1024  ;;  %p2329_p12 = scmp.lt.s32.totalorder %s25_s24, %s25_s24 }
  0x1c   :  { %p2325_p11 = scmp.ne.s32.totalorder %s25_s24, %s2324_s12  ;;  %p2330_p13 = scmp.lt.s32.totalorder %s2324_s12, %s2324_s12 }
  0x1e   :  { %p2331_p0 = por %p2330_p13, %p2329_p12 }
  0x20   :  { %p2332_p1 = pnand %p2331_p0, %p2325_p11 }
  0x22   :  { %2335 = shalt.err (!%p2332_p1)
}
  0x23   :  { %s2436_s1 = smov 128   ;;  %s2437_s10 = smov 8  }
  0x24   :  { %30 = dma.hbm_to_vmem [thread:$0]  %s2910_s0, 1024, %s25_s24, [#allocation4], %s2436_s1, %s2436_s1, %s2437_s10  }
  0x25   :  { %s2438_s15 = smov [#allocation8]   ;;  %s2336_s20 = scalar_lea.hbm %s2912_s2, 768 }
  0x26   :  { %s48_s16 = sshll.u32 %s2438_s15, 4  ;;  %p2337_p2 = scmp.ne.s32.totalorder %s2912_s2, %s2336_s20  ;;  %s49_s16 = int_to_ptr.vmem [resolvable:$true] %s48_s16 }
  0x27   :  { %p2340_p3 = scmp.lt.u32.totalorder %s2336_s20, %s2912_s2 }
  0x29   :  { %p2342_p4 = pnand %p2340_p3, %p2337_p2 }
  0x2b   :  { %2345 = shalt.err (!%p2342_p4)
}
  0x2c   :  { %s2346_s26 = scalar_lea.vmem %s49_s16, 768  ;;  %p2351_p6 = scmp.lt.s32.totalorder %s49_s16, %s49_s16 }
  0x2d   :  { %p2347_p5 = scmp.ne.s32.totalorder %s49_s16, %s2346_s26  ;;  %p2352_p7 = scmp.lt.s32.totalorder %s2346_s26, %s2346_s26 }
  0x2f   :  { %p2353_p8 = por %p2352_p7, %p2351_p6 }
  0x31   :  { %p2354_p9 = pnand %p2353_p8, %p2347_p5 }
  0x33   :  { %2357 = shalt.err (!%p2354_p9)
}
  0x34   :  { %s2439_s0 = smov 192   ;;  %s2440_s24 = smov 12  }
  0x35   :  { %54 = dma.hbm_to_vmem [thread:$0]  %s2912_s2, 768, %s49_s16, [#allocation7], %s2439_s0, %s2439_s0, %s2440_s24  }
  0x36   :  { %2424 = dma.done.wait [#allocation4], 1024  }
  0x37   :  { %2425 = vsyncadd [#allocation4], 4294966272 }
  0x38   :  { %2426 = dma.done.wait [#allocation7], 1024  }
  0x39   :  { %2427 = vsyncadd [#allocation7], 4294966272  ;;  %v2441_v0 = vmov 0   ;;  %v2132_v1 = vld [vmem:[#allocation6] sm:$0xff]   ;;  %v2544_v3 = vld [vmem:[#allocation8] ss:$12 sps:$4 sm:$0xff]  }
  0x3a   :  { %251 = vmatprep.mubr.bf16.mxu1 %v2441_v0  ;;  %v2542_v2 = vld [vmem:[#allocation8 + $0x4] ss:$12 sps:$4 sm:$0xff]   ;;  %2026 = vmatprep.subr.bf16.mxu0 %v2132_v1  ;;  %v2136_v4 = vld [vmem:[#allocation6 + $0x8] sm:$0xff]   ;;  %vm108_vm0 = vcmask 261120   ;;  %v76_v10 = vld [vmem:[#allocation3 + $0x18] sm:$0xff]  ;;  %v2442_v13 = vmov 0.0|0.0  }
  0x3b   :  { %219 = vmatprep.subr.bf16.mxu1 %v2542_v2  ;;  %2027 = vmatpush3.bf16.msra.mxu0 %v2132_v1  ;;  %v2548_v5 = vld [vmem:[#allocation8 + $0x1c] ss:$12 sps:$4 sm:$0xff]   ;;  %v2550_v6 = vld [vmem:[#allocation8 + $0x18] ss:$12 sps:$4 sm:$0xff]   ;;  %v73_v7 = vld [vmem:[#allocation3] sm:$0xff]  ;;  %v2444_v32 = vmov 0.0  }
  0x3c   :  { %220 = vmatpush1.bf16.msra.mxu1 %v2544_v3  ;;  %2028 = vmatprep.subr.bf16.mxu0 %v2136_v4  ;;  %v74_v8 = vld [vmem:[#allocation3 + $0x8] sm:$0xff]  ;;  %v75_v9 = vld [vmem:[#allocation3 + $0x10] sm:$0xff]  ;;  %v2565_v14 = vld [vmem:[%s2913_s3] ss:$0 sm:$0xff]  ;;  %s2443_s3 = smov 32   ;;  %vm2445_vm1 = vmmov 0  }
  0x3d   :  { %221 = vmatprep.subr.bf16.mxu1 %v2548_v5  ;;  %v81_v11 = vpack.c.bf16 %v74_v8, %v73_v7  ;;  %v82_v12 = vpack.c.bf16 %v76_v10, %v75_v9  ;;  %v2140_v36 = vld [vmem:[#allocation8 + $0x8] ss:$12 sps:$4 sm:$0xff]   ;;  %v78_v38 = vld [vmem:[#allocation3 + $0x28] sm:$0xff]  ;;  %v79_v40 = vld [vmem:[#allocation3 + $0x30] sm:$0xff] }
  0x3e   :  { %v77_v37 = vld [vmem:[#allocation3 + $0x20] sm:$0xff]  ;;  %v80_v41 = vld [vmem:[#allocation3 + $0x38] sm:$0xff] }
  0x3f   :  { %2029 = vmatpush3.bf16.msra.mxu0 %v2136_v4  ;;  %2030 = vmatprep.mubr.msk.bf16.mxu0 %vm108_vm0, %v81_v11  ;;  %v83_v39 = vpack.c.bf16 %v78_v38, %v77_v37  ;;  %v84_v42 = vpack.c.bf16 %v80_v41, %v79_v40  ;;  %v2141_v43 = vld [vmem:[#allocation8 + $0x20] ss:$12 sps:$4 sm:$0xff]   ;;  %v2608_v60 = vld [vmem:[%s2914_s4] ss:$0 sm:$0xff]  ;;  %s2446_s4 = smov 96  }
  0x40   :  { %222 = vmatpush1.bf16.msra.mxu1 %v2550_v6  ;;  %2038 = vmatprep.subr.bf16.mxu0 %v2444_v32 }
  0x41   :  { %303 = vmatprep.subr.bf16.mxu1 %v2542_v2 }
  0x42   :  { %2031 = vmatmul.mubr.msk.bf16.vlgmr.msra.gmra.mrb[0].mxu0 %vm108_vm0, %v82_v12 }
  0x43   :  { %252 = vmatmul.mubr.bf16.vlgmr.msra.gmra.mrb[0].mxu1 %v2442_v13  ;;  %2039 = vmatpush3.bf16.msra.mxu0 %v2140_v36 }
  0x44   :  { %304 = vmatpush1.bf16.msra.mxu1 %v2544_v3  ;;  %335 = vmatprep.mubr.bf16.mxu1 %v2441_v0 }
  0x45   :  { %305 = vmatprep.subr.bf16.mxu1 %v2548_v5  ;;  %2034 = vmatprep.mubr.msk.bf16.mxu0 %vm108_vm0, %v83_v39 }
  0x46   :  { %2040 = vmatprep.subr.bf16.mxu0 %v2444_v32 }
  0x47   :  { %2041 = vmatpush3.bf16.msra.mxu0 %v2141_v43 }
  0x48   :  { %306 = vmatpush1.bf16.msra.mxu1 %v2550_v6  ;;  %2046 = vmatprep.subr.bf16.mxu0 %v2444_v32 }
  0x49   :  { %493 = vmatprep.subr.bf16.mxu1 %v2542_v2 }
  0x4a   :  { %2035 = vmatmul.mubr.msk.bf16.gmra.mrb[4].mxu0 %vm108_vm0, %v84_v42 }
  0x4b   :  { %2042 = vmatprep.mubr.msk.bf16.mxu0 %vm2445_vm1, %v2444_v32 }
 0x115   :  { %v2567_v15 = vpop.f32.mrb[0].mxu0 }
 0x116   :  { %v253_v16 = vpop.f32.mrb[0].mxu1  ;;  %v155_v17 = vpop.f32.mrb[1].mxu0  ;;  %v164_v41 = vadd.f32 %v2567_v15, %v2565_v14 }
 0x117   :  { %v156_v18 = vadd.f32 %v2565_v14, %v155_v17  ;;  %v255_v19 = vpop.f32.mrb[1].mxu1  ;;  %v2570_v20 = vpop.f32.mrb[2].mxu0 }
 0x118   :  { %v256_v21 = vpop.f32.mrb[2].mxu1  ;;  %v158_v22 = vpop.f32.mrb[3].mxu0 }
 0x119   :  { %v259_v23 = vadd.f32 %v253_v16, %v156_v18  ;;  %v257_v24 = vpop.f32.mrb[3].mxu1  ;;  %v159_v53 = vadd.f32 %v2565_v14, %v158_v22 }
 0x11b   :  { %2164 = vtanh.f32 %v259_v23  ;;  %v1906_v26 = vmul.f32 -1.442695, %v259_v23 }
 0x11d   :  { %2166 = vpow2.f32 %v1906_v26  ;;  %v2587_v48 = vpop.f32.mrb[4].mxu0 }
 0x11e   :  { %v2589_v49 = vpop.f32.mrb[5].mxu0 }
 0x11f   :  { %v2591_v50 = vpop.f32.mrb[6].mxu0 }
 0x120   :  { %v2593_v51 = vpop.f32.mrb[7].mxu0 }
 0x125   :  { %v2165_v25 = vpop.eup %2164 }
 0x126   :  { %269 = vrot.lane.b32.xlu0 %v2165_v25, %s2433_s19 }
 0x127   :  { %v2167_v27 = vpop.eup %2166 }
 0x128   :  { %v263_v28 = vadd.f32 1.0, %v2167_v27 }
 0x12a   :  { %2168 = vrcp.f32 %v263_v28 }
 0x134   :  { %v2169_v29 = vpop.eup %2168 }
 0x135   :  { %v267_v33 = vmul.f32 0.0, %v2169_v29 }
 0x198   :  { %v270_v30 = vpop.permute.xlu0 %269 }
 0x199   :  { %v272_v31 = vmul.f32 %v2169_v29, %v270_v30  ;;  %v2142_v30 = vld [vmem:[#allocation8 + $0x8] ss:$12 sps:$4 sm:$0xff]  }
 0x19b   :  { %274 = vrot.lane.b32.xlu0 %v272_v31, %s2443_s3  ;;  %v2143_v31 = vld [vmem:[#allocation8 + $0x20] ss:$12 sps:$4 sm:$0xff]  }
 0x20d   :  { %v275_v34 = vpop.permute.xlu0 %274 }
 0x20e   :  { %v2575_v35 = vadd.f32 %v275_v34, %v267_v33 }
 0x210   :  { %2170 = vtanh.f32 %v2575_v35 }
 0x21a   :  { %v2171_v44 = vpop.eup %2170 }
 0x21b   :  { %280 = vrot.lane.b32.xlu1 %v2171_v44, %s2433_s19 }
 0x28d   :  { %v281_v45 = vpop.permute.xlu1 %280 }
 0x28e   :  { %v283_v46 = vmul.f32 %v2169_v29, %v281_v45 }
 0x290   :  { %v284_v47 = vpack.c.bf16 %v2444_v32, %v283_v46 }
 0x292   :  { %286 = vrot.lane.b32.xlu1 %v284_v47, %s2443_s3 }
 0x304   :  { %v287_v52 = vpop.permute.xlu1 %286 }
 0x305   :  { %1909 = vmatmul.mubr.msk.bf16.vlgmr.msra.gmra.mrb[4].mxu1 %vm108_vm0, %v287_v52  ;;  %2043 = vmatmul.mubr.msk.bf16.vlgmr.msra.gmra.mrb[8].mxu0 %vm108_vm0, %v287_v52 }
 0x306   :  { %494 = vmatpush1.bf16.msra.mxu1 %v2544_v3  ;;  %525 = vmatprep.mubr.bf16.mxu1 %v2441_v0 }
 0x307   :  { %495 = vmatprep.subr.bf16.mxu1 %v2548_v5  ;;  %2050 = vmatprep.mubr.msk.bf16.mxu0 %vm2445_vm1, %v2444_v32 }
 0x308   :  { %2047 = vmatpush3.bf16.msra.mxu0 %v2142_v30 }
 0x309   :  { %2048 = vmatprep.subr.bf16.mxu0 %v2444_v32 }
 0x30a   :  { %496 = vmatpush1.bf16.msra.mxu1 %v2550_v6 }
 0x30b   :  { %677 = vmatprep.subr.bf16.mxu1 %v2542_v2 }
 0x30c   :  { %2049 = vmatpush3.bf16.msra.mxu0 %v2143_v31  ;;  %v167_v31 = vadd.f32 %v2570_v20, %v2565_v14 }
 0x30d   :  { %2054 = vmatprep.subr.bf16.mxu0 %v2444_v32 }
 0x3d8   :  { %v337_v54 = vpop.f32.mrb[4].mxu1  ;;  %v378_v55 = vpop.f32.mrb[8].mxu0 }
 0x3d9   :  { %v384_v56 = vadd.f32 %v337_v54, %v159_v53  ;;  %v339_v57 = vpop.f32.mrb[5].mxu1  ;;  %v2044_v58 = vpop.f32.mrb[9].mxu0 }
 0x3da   :  { %v341_v59 = vpop.f32.mrb[6].mxu1  ;;  %v380_v61 = vpop.f32.mrb[10].mxu0 }
 0x3db   :  { %2172 = vtanh.f32 %v384_v56  ;;  %v409_v62 = vadd.f32 %v380_v61, %v339_v57  ;;  %v342_v63 = vpop.f32.mrb[7].mxu1  ;;  %v2045_v1 = vpop.f32.mrb[11].mxu0  ;;  %v1911_v9 = vmul.f32 -1.442695, %v384_v56 }
 0x3dd   :  { %v416_v4 = vadd.f32 %v2608_v60, %v409_v62 }
 0x3df   :  { %2174 = vtanh.f32 %v416_v4  ;;  %v1913_v10 = vmul.f32 -1.442695, %v416_v4 }
 0x3e0   :  { %2176 = vpow2.f32 %v1911_v9 }
 0x3e1   :  { %2178 = vpow2.f32 %v1913_v10 }
 0x3e5   :  { %v2173_v7 = vpop.eup %2172 }
 0x3e6   :  { %394 = vrot.lane.b32.xlu0 %v2173_v7, %s2433_s19 }
 0x3e9   :  { %v2175_v8 = vpop.eup %2174 }
 0x3ea   :  { %426 = vrot.lane.b32.xlu1 %v2175_v8, %s2433_s19  ;;  %v2177_v11 = vpop.eup %2176 }
 0x3eb   :  { %v388_v12 = vadd.f32 1.0, %v2177_v11  ;;  %v2179_v13 = vpop.eup %2178 }
 0x3ec   :  { %v420_v16 = vadd.f32 1.0, %v2179_v13 }
 0x3ed   :  { %2180 = vrcp.f32 %v388_v12 }
 0x3ee   :  { %2182 = vrcp.f32 %v420_v16 }
 0x3f7   :  { %v2181_v17 = vpop.eup %2180 }
 0x3f8   :  { %v2183_v21 = vpop.eup %2182  ;;  %v392_v24 = vmul.f32 %v2181_v17, %v2575_v35 }
 0x3f9   :  { %v424_v27 = vmul.f32 0.0, %v2183_v21 }
 0x458   :  { %v395_v18 = vpop.permute.xlu0 %394 }
 0x459   :  { %v397_v19 = vmul.f32 %v2181_v17, %v395_v18 }
 0x45b   :  { %399 = vrot.lane.b32.xlu0 %v397_v19, %s2443_s3 }
 0x45c   :  { %v427_v22 = vpop.permute.xlu1 %426 }
 0x45d   :  { %v429_v23 = vmul.f32 %v2183_v21, %v427_v22  ;;  %v2145_v22 = vld [vmem:[#allocation8 + $0x20] ss:$12 sps:$4 sm:$0xff]  }
 0x45f   :  { %431 = vrot.lane.b32.xlu1 %v429_v23, %s2443_s3 }
 0x4cd   :  { %v400_v25 = vpop.permute.xlu0 %399 }
 0x4ce   :  { %v2616_v26 = vadd.f32 %v400_v25, %v392_v24 }
 0x4d0   :  { %2184 = vtanh.f32 %v2616_v26 }
 0x4d1   :  { %v432_v28 = vpop.permute.xlu1 %431 }
 0x4d2   :  { %v2619_v29 = vadd.f32 %v432_v28, %v424_v27 }
 0x4d4   :  { %2186 = vtanh.f32 %v2619_v29 }
 0x4da   :  { %v2185_v33 = vpop.eup %2184 }
 0x4db   :  { %405 = vrot.lane.b32.xlu0 %v2185_v33, %s2433_s19 }
 0x4de   :  { %v2187_v34 = vpop.eup %2186 }
 0x4df   :  { %437 = vrot.lane.b32.xlu1 %v2187_v34, %s2433_s19 }
 0x54d   :  { %v406_v35 = vpop.permute.xlu0 %405 }
 0x54e   :  { %v408_v37 = vmul.f32 %v2181_v17, %v406_v35 }
 0x551   :  { %v438_v36 = vpop.permute.xlu1 %437 }
 0x552   :  { %v2626_v38 = vmul.f32 %v2183_v21, %v438_v36  ;;  %v2144_v21 = vld [vmem:[#allocation8 + $0x8] ss:$12 sps:$4 sm:$0xff]  }
 0x554   :  { %v446_v39 = vpack.c.bf16 %v2626_v38, %v408_v37 }
 0x556   :  { %456 = vrot.lane.b32.xlu0 %v446_v39, %s2443_s3 }
 0x5c8   :  { %v457_v40 = vpop.permute.xlu0 %456 }
 0x5c9   :  { %1920 = vmatmul.mubr.msk.bf16.vlgmr.msra.gmra.mrb[8].mxu1 %vm108_vm0, %v457_v40  ;;  %2051 = vmatmul.mubr.msk.bf16.vlgmr.msra.gmra.mrb[12].mxu0 %vm108_vm0, %v457_v40 }
 0x5ca   :  { %678 = vmatpush1.bf16.msra.mxu1 %v2544_v3  ;;  %709 = vmatprep.mubr.bf16.mxu1 %v2441_v0 }
 0x5cb   :  { %679 = vmatprep.subr.bf16.mxu1 %v2548_v5  ;;  %2058 = vmatprep.mubr.msk.bf16.mxu0 %vm2445_vm1, %v2444_v32 }
 0x5cc   :  { %2055 = vmatpush3.bf16.msra.mxu0 %v2144_v21 }
 0x5cd   :  { %2056 = vmatprep.subr.bf16.mxu0 %v2444_v32 }
 0x5ce   :  { %680 = vmatpush1.bf16.msra.mxu1 %v2550_v6 }
 0x5cf   :  { %861 = vmatprep.subr.bf16.mxu1 %v2542_v2 }
 0x5d0   :  { %2057 = vmatpush3.bf16.msra.mxu0 %v2145_v22  ;;  %v172_v22 = vadd.f32 %v2565_v14, %v2589_v49 }
 0x5d1   :  { %2062 = vmatprep.subr.bf16.mxu0 %v2444_v32 }
 0x69c   :  { %v527_v42 = vpop.f32.mrb[8].mxu1  ;;  %v568_v43 = vpop.f32.mrb[12].mxu0 }
 0x69d   :  { %v574_v44 = vadd.f32 %v527_v42, %v164_v41  ;;  %v529_v45 = vpop.f32.mrb[9].mxu1  ;;  %v2052_v46 = vpop.f32.mrb[13].mxu0 }
 0x69e   :  { %v531_v47 = vpop.f32.mrb[10].mxu1  ;;  %v570_v52 = vpop.f32.mrb[14].mxu0 }
 0x69f   :  { %2188 = vtanh.f32 %v574_v44  ;;  %v599_v53 = vadd.f32 %v570_v52, %v529_v45  ;;  %v532_v54 = vpop.f32.mrb[11].mxu1  ;;  %v2053_v55 = vpop.f32.mrb[15].mxu0  ;;  %v1922_v15 = vmul.f32 -1.442695, %v574_v44 }
 0x6a1   :  { %v600_v56 = vadd.f32 %v2608_v60, %v599_v53 }
 0x6a3   :  { %2190 = vtanh.f32 %v600_v56  ;;  %v1923_v59 = vmul.f32 -1.442695, %v600_v56 }
 0x6a4   :  { %2192 = vpow2.f32 %v1922_v15 }
 0x6a5   :  { %2194 = vpow2.f32 %v1923_v59 }
 0x6a9   :  { %v2189_v57 = vpop.eup %2188 }
 0x6aa   :  { %584 = vrot.lane.b32.xlu1 %v2189_v57, %s2433_s19 }
 0x6ad   :  { %v2191_v58 = vpop.eup %2190 }
 0x6ae   :  { %610 = vrot.lane.b32.xlu0 %v2191_v58, %s2433_s19  ;;  %v2193_v61 = vpop.eup %2192 }
 0x6af   :  { %v578_v62 = vadd.f32 1.0, %v2193_v61  ;;  %v2195_v63 = vpop.eup %2194 }
 0x6b0   :  { %v604_v1 = vadd.f32 1.0, %v2195_v63 }
 0x6b1   :  { %2196 = vrcp.f32 %v578_v62 }
 0x6b2   :  { %2198 = vrcp.f32 %v604_v1 }
 0x6bb   :  { %v2197_v4 = vpop.eup %2196 }
 0x6bc   :  { %v2199_v9 = vpop.eup %2198  ;;  %v582_v12 = vmul.f32 %v2197_v4, %v2616_v26 }
 0x6bd   :  { %v608_v17 = vmul.f32 %v2199_v9, %v2619_v29 }
 0x71c   :  { %v585_v7 = vpop.permute.xlu1 %584 }
 0x71d   :  { %v587_v8 = vmul.f32 %v2197_v4, %v585_v7 }
 0x71f   :  { %589 = vrot.lane.b32.xlu1 %v587_v8, %s2443_s3 }
 0x720   :  { %v611_v10 = vpop.permute.xlu0 %610 }
 0x721   :  { %v613_v11 = vmul.f32 %v2199_v9, %v611_v10  ;;  %v2147_v10 = vld [vmem:[#allocation8 + $0x20] ss:$12 sps:$4 sm:$0xff]  }
 0x723   :  { %615 = vrot.lane.b32.xlu0 %v613_v11, %s2443_s3 }
 0x791   :  { %v590_v13 = vpop.permute.xlu1 %589 }
 0x792   :  { %v2647_v16 = vadd.f32 %v590_v13, %v582_v12 }
 0x794   :  { %2200 = vtanh.f32 %v2647_v16 }
 0x795   :  { %v616_v18 = vpop.permute.xlu0 %615 }
 0x796   :  { %v2651_v19 = vadd.f32 %v616_v18, %v608_v17 }
 0x798   :  { %2202 = vtanh.f32 %v2651_v19 }
 0x79e   :  { %v2201_v23 = vpop.eup %2200 }
 0x79f   :  { %595 = vrot.lane.b32.xlu1 %v2201_v23, %s2433_s19 }
 0x7a2   :  { %v2203_v24 = vpop.eup %2202 }
 0x7a3   :  { %621 = vrot.lane.b32.xlu0 %v2203_v24, %s2433_s19 }
 0x811   :  { %v596_v25 = vpop.permute.xlu1 %595 }
 0x812   :  { %v598_v27 = vmul.f32 %v2197_v4, %v596_v25 }
 0x815   :  { %v622_v26 = vpop.permute.xlu0 %621 }
 0x816   :  { %v2658_v28 = vmul.f32 %v2199_v9, %v622_v26  ;;  %v2146_v9 = vld [vmem:[#allocation8 + $0x8] ss:$12 sps:$4 sm:$0xff]  }
 0x818   :  { %v630_v29 = vpack.c.bf16 %v2658_v28, %v598_v27 }
 0x81a   :  { %640 = vrot.lane.b32.xlu1 %v630_v29, %s2443_s3 }
 0x88c   :  { %v641_v30 = vpop.permute.xlu1 %640 }
 0x88d   :  { %1930 = vmatmul.mubr.msk.bf16.vlgmr.msra.gmra.mrb[12].mxu1 %vm108_vm0, %v641_v30  ;;  %2059 = vmatmul.mubr.msk.bf16.vlgmr.msra.gmra.mrb[16].mxu0 %vm108_vm0, %v641_v30 }
 0x88e   :  { %862 = vmatpush1.bf16.msra.mxu1 %v2544_v3  ;;  %893 = vmatprep.mubr.bf16.mxu1 %v2441_v0 }
 0x88f   :  { %863 = vmatprep.subr.bf16.mxu1 %v2548_v5  ;;  %2066 = vmatprep.mubr.msk.bf16.mxu0 %vm2445_vm1, %v2444_v32 }
 0x890   :  { %2063 = vmatpush3.bf16.msra.mxu0 %v2146_v9 }
 0x891   :  { %2064 = vmatprep.subr.bf16.mxu0 %v2444_v32 }
 0x892   :  { %864 = vmatpush1.bf16.msra.mxu1 %v2550_v6 }
 0x893   :  { %1045 = vmatprep.subr.bf16.mxu1 %v2542_v2 }
 0x894   :  { %2065 = vmatpush3.bf16.msra.mxu0 %v2147_v10  ;;  %v175_v10 = vadd.f32 %v2565_v14, %v2593_v51 }
 0x895   :  { %2070 = vmatprep.subr.bf16.mxu0 %v2444_v32 }
 0x960   :  { %v711_v33 = vpop.f32.mrb[12].mxu1  ;;  %v752_v34 = vpop.f32.mrb[16].mxu0 }
 0x961   :  { %v758_v35 = vadd.f32 %v711_v33, %v167_v31  ;;  %v713_v36 = vpop.f32.mrb[13].mxu1  ;;  %v2060_v37 = vpop.f32.mrb[17].mxu0 }
 0x962   :  { %v715_v39 = vpop.f32.mrb[14].mxu1  ;;  %v754_v40 = vpop.f32.mrb[18].mxu0 }
 0x963   :  { %2204 = vtanh.f32 %v758_v35  ;;  %v783_v41 = vadd.f32 %v754_v40, %v713_v36  ;;  %v716_v42 = vpop.f32.mrb[15].mxu1  ;;  %v2061_v43 = vpop.f32.mrb[19].mxu0  ;;  %v1932_v20 = vmul.f32 -1.442695, %v758_v35 }
 0x965   :  { %v784_v44 = vadd.f32 %v2608_v60, %v783_v41 }
 0x967   :  { %2206 = vtanh.f32 %v784_v44  ;;  %v1933_v47 = vmul.f32 -1.442695, %v784_v44 }
 0x968   :  { %2208 = vpow2.f32 %v1932_v20 }
 0x969   :  { %2210 = vpow2.f32 %v1933_v47 }
 0x96d   :  { %v2205_v45 = vpop.eup %2204 }
 0x96e   :  { %768 = vrot.lane.b32.xlu0 %v2205_v45, %s2433_s19 }
 0x971   :  { %v2207_v46 = vpop.eup %2206 }
 0x972   :  { %794 = vrot.lane.b32.xlu1 %v2207_v46, %s2433_s19  ;;  %v2209_v52 = vpop.eup %2208 }
 0x973   :  { %v762_v53 = vadd.f32 1.0, %v2209_v52  ;;  %v2211_v54 = vpop.eup %2210 }
 0x974   :  { %v788_v55 = vadd.f32 1.0, %v2211_v54 }
 0x975   :  { %2212 = vrcp.f32 %v762_v53 }
 0x976   :  { %2214 = vrcp.f32 %v788_v55 }
 0x97f   :  { %v2213_v56 = vpop.eup %2212 }
 0x980   :  { %v2215_v15 = vpop.eup %2214  ;;  %v766_v62 = vmul.f32 %v2213_v56, %v2647_v16 }
 0x981   :  { %v792_v4 = vmul.f32 %v2215_v15, %v2651_v19 }
 0x9e0   :  { %v769_v57 = vpop.permute.xlu0 %768 }
 0x9e1   :  { %v771_v58 = vmul.f32 %v2213_v56, %v769_v57 }
 0x9e3   :  { %773 = vrot.lane.b32.xlu0 %v771_v58, %s2443_s3 }
 0x9e4   :  { %v795_v59 = vpop.permute.xlu1 %794 }
 0x9e5   :  { %v797_v61 = vmul.f32 %v2215_v15, %v795_v59  ;;  %v2149_v59 = vld [vmem:[#allocation8 + $0x20] ss:$12 sps:$4 sm:$0xff]  }
 0x9e7   :  { %799 = vrot.lane.b32.xlu1 %v797_v61, %s2443_s3 }
 0xa55   :  { %v774_v63 = vpop.permute.xlu0 %773 }
 0xa56   :  { %v2679_v1 = vadd.f32 %v774_v63, %v766_v62 }
 0xa58   :  { %2216 = vtanh.f32 %v2679_v1 }
 0xa59   :  { %v800_v7 = vpop.permute.xlu1 %799 }
 0xa5a   :  { %v2683_v8 = vadd.f32 %v800_v7, %v792_v4 }
 0xa5c   :  { %2218 = vtanh.f32 %v2683_v8 }
 0xa62   :  { %v2217_v11 = vpop.eup %2216 }
 0xa63   :  { %779 = vrot.lane.b32.xlu0 %v2217_v11, %s2433_s19 }
 0xa66   :  { %v2219_v12 = vpop.eup %2218 }
 0xa67   :  { %805 = vrot.lane.b32.xlu1 %v2219_v12, %s2433_s19 }
 0xad5   :  { %v780_v13 = vpop.permute.xlu0 %779 }
 0xad6   :  { %v782_v17 = vmul.f32 %v2213_v56, %v780_v13 }
 0xad9   :  { %v806_v16 = vpop.permute.xlu1 %805 }
 0xada   :  { %v2690_v18 = vmul.f32 %v2215_v15, %v806_v16  ;;  %v2148_v15 = vld [vmem:[#allocation8 + $0x8] ss:$12 sps:$4 sm:$0xff]  }
 0xadc   :  { %v814_v19 = vpack.c.bf16 %v2690_v18, %v782_v17 }
 0xade   :  { %824 = vrot.lane.b32.xlu0 %v814_v19, %s2443_s3 }
 0xb50   :  { %v825_v21 = vpop.permute.xlu0 %824 }
 0xb51   :  { %1940 = vmatmul.mubr.msk.bf16.vlgmr.msra.gmra.mrb[16].mxu1 %vm108_vm0, %v825_v21  ;;  %2067 = vmatmul.mubr.msk.bf16.vlgmr.msra.gmra.mrb[20].mxu0 %vm108_vm0, %v825_v21 }
 0xb52   :  { %1046 = vmatpush1.bf16.msra.mxu1 %v2544_v3  ;;  %1077 = vmatprep.mubr.bf16.mxu1 %v2441_v0 }
 0xb53   :  { %1047 = vmatprep.subr.bf16.mxu1 %v2548_v5  ;;  %2074 = vmatprep.mubr.msk.bf16.mxu0 %vm2445_vm1, %v2444_v32 }
 0xb54   :  { %2071 = vmatpush3.bf16.msra.mxu0 %v2148_v15  ;;  %v180_v15 = vadd.f32 %v2587_v48, %v2565_v14 }
 0xb55   :  { %2072 = vmatprep.subr.bf16.mxu0 %v2444_v32 }
 0xb56   :  { %1048 = vmatpush1.bf16.msra.mxu1 %v2550_v6 }
 0xb57   :  { %1229 = vmatprep.subr.bf16.mxu1 %v2542_v2 }
 0xb58   :  { %2073 = vmatpush3.bf16.msra.mxu0 %v2149_v59 }
 0xb59   :  { %2078 = vmatprep.subr.bf16.mxu0 %v2444_v32 }
 0xc24   :  { %v895_v23 = vpop.f32.mrb[16].mxu1  ;;  %v936_v24 = vpop.f32.mrb[20].mxu0 }
 0xc25   :  { %v942_v25 = vadd.f32 %v895_v23, %v172_v22  ;;  %v897_v26 = vpop.f32.mrb[17].mxu1  ;;  %v2068_v27 = vpop.f32.mrb[21].mxu0 }
 0xc26   :  { %v899_v29 = vpop.f32.mrb[18].mxu1  ;;  %v938_v30 = vpop.f32.mrb[22].mxu0 }
 0xc27   :  { %2220 = vtanh.f32 %v942_v25  ;;  %v967_v31 = vadd.f32 %v938_v30, %v897_v26  ;;  %v900_v33 = vpop.f32.mrb[19].mxu1  ;;  %v2069_v34 = vpop.f32.mrb[23].mxu0  ;;  %v1942_v49 = vmul.f32 -1.442695, %v942_v25 }
 0xc29   :  { %v968_v35 = vadd.f32 %v2608_v60, %v967_v31 }
 0xc2b   :  { %2222 = vtanh.f32 %v968_v35  ;;  %v1943_v39 = vmul.f32 -1.442695, %v968_v35 }
 0xc2c   :  { %2224 = vpow2.f32 %v1942_v49 }
 0xc2d   :  { %2226 = vpow2.f32 %v1943_v39 }
 0xc31   :  { %v2221_v36 = vpop.eup %2220 }
 0xc32   :  { %952 = vrot.lane.b32.xlu1 %v2221_v36, %s2433_s19 }
 0xc35   :  { %v2223_v37 = vpop.eup %2222 }
 0xc36   :  { %978 = vrot.lane.b32.xlu0 %v2223_v37, %s2433_s19  ;;  %v2225_v40 = vpop.eup %2224 }
 0xc37   :  { %v946_v41 = vadd.f32 1.0, %v2225_v40  ;;  %v2227_v42 = vpop.eup %2226 }
 0xc38   :  { %v972_v43 = vadd.f32 1.0, %v2227_v42 }
 0xc39   :  { %2228 = vrcp.f32 %v946_v41 }
 0xc3a   :  { %2230 = vrcp.f32 %v972_v43 }
 0xc43   :  { %v2229_v44 = vpop.eup %2228 }
 0xc44   :  { %v2231_v20 = vpop.eup %2230  ;;  %v950_v53 = vmul.f32 %v2229_v44, %v2679_v1 }
 0xc45   :  { %v976_v56 = vmul.f32 %v2231_v20, %v2683_v8 }
 0xca4   :  { %v953_v45 = vpop.permute.xlu1 %952 }
 0xca5   :  { %v955_v46 = vmul.f32 %v2229_v44, %v953_v45 }
 0xca7   :  { %957 = vrot.lane.b32.xlu1 %v955_v46, %s2443_s3  ;;  %v2150_v46 = vld [vmem:[#allocation8 + $0x8] ss:$12 sps:$4 sm:$0xff]  }
 0xca8   :  { %v979_v47 = vpop.permute.xlu0 %978 }
 0xca9   :  { %v981_v52 = vmul.f32 %v2231_v20, %v979_v47 }
 0xcab   :  { %983 = vrot.lane.b32.xlu0 %v981_v52, %s2443_s3 }
 0xd19   :  { %v958_v54 = vpop.permute.xlu1 %957 }
 0xd1a   :  { %v2711_v55 = vadd.f32 %v958_v54, %v950_v53 }
 0xd1c   :  { %2232 = vtanh.f32 %v2711_v55 }
 0xd1d   :  { %v984_v57 = vpop.permute.xlu0 %983 }
 0xd1e   :  { %v2715_v58 = vadd.f32 %v984_v57, %v976_v56 }
 0xd20   :  { %2234 = vtanh.f32 %v2715_v58 }
 0xd26   :  { %v2233_v61 = vpop.eup %2232 }
 0xd27   :  { %963 = vrot.lane.b32.xlu1 %v2233_v61, %s2433_s19 }
 0xd2a   :  { %v2235_v62 = vpop.eup %2234 }
 0xd2b   :  { %989 = vrot.lane.b32.xlu0 %v2235_v62, %s2433_s19 }
 0xd99   :  { %v964_v63 = vpop.permute.xlu1 %963 }
 0xd9a   :  { %v966_v4 = vmul.f32 %v2229_v44, %v964_v63 }
 0xd9d   :  { %v990_v1 = vpop.permute.xlu0 %989 }
 0xd9e   :  { %v2722_v7 = vmul.f32 %v2231_v20, %v990_v1  ;;  %v2151_v20 = vld [vmem:[#allocation8 + $0x20] ss:$12 sps:$4 sm:$0xff]  }
 0xda0   :  { %v998_v8 = vpack.c.bf16 %v2722_v7, %v966_v4 }
 0xda2   :  { %1008 = vrot.lane.b32.xlu1 %v998_v8, %s2443_s3 }
 0xe14   :  { %v1009_v9 = vpop.permute.xlu1 %1008 }
 0xe15   :  { %1950 = vmatmul.mubr.msk.bf16.vlgmr.msra.gmra.mrb[20].mxu1 %vm108_vm0, %v1009_v9  ;;  %2075 = vmatmul.mubr.msk.bf16.vlgmr.msra.gmra.mrb[24].mxu0 %vm108_vm0, %v1009_v9 }
 0xe16   :  { %1230 = vmatpush1.bf16.msra.mxu1 %v2544_v3  ;;  %1261 = vmatprep.mubr.bf16.mxu1 %v2441_v0 }
 0xe17   :  { %1231 = vmatprep.subr.bf16.mxu1 %v2548_v5  ;;  %2082 = vmatprep.mubr.msk.bf16.mxu0 %vm2445_vm1, %v2444_v32 }
 0xe18   :  { %2079 = vmatpush3.bf16.msra.mxu0 %v2150_v46 }
 0xe19   :  { %2080 = vmatprep.subr.bf16.mxu0 %v2444_v32 }
 0xe1a   :  { %1232 = vmatpush1.bf16.msra.mxu1 %v2550_v6 }
 0xe1b   :  { %1413 = vmatprep.subr.bf16.mxu1 %v2542_v2 }
 0xe1c   :  { %2081 = vmatpush3.bf16.msra.mxu0 %v2151_v20 }
 0xe1d   :  { %2086 = vmatprep.subr.bf16.mxu0 %v2444_v32 }
 0xee8   :  { %v1079_v11 = vpop.f32.mrb[20].mxu1  ;;  %v1120_v12 = vpop.f32.mrb[24].mxu0 }
 0xee9   :  { %v1126_v13 = vadd.f32 %v1079_v11, %v175_v10  ;;  %v1081_v16 = vpop.f32.mrb[21].mxu1  ;;  %v2076_v17 = vpop.f32.mrb[25].mxu0 }
 0xeea   :  { %v1083_v19 = vpop.f32.mrb[22].mxu1  ;;  %v1122_v21 = vpop.f32.mrb[26].mxu0 }
 0xeeb   :  { %2236 = vtanh.f32 %v1126_v13  ;;  %v1151_v22 = vadd.f32 %v1122_v21, %v1081_v16  ;;  %v1084_v23 = vpop.f32.mrb[23].mxu1  ;;  %v2077_v24 = vpop.f32.mrb[27].mxu0  ;;  %v1952_v51 = vmul.f32 -1.442695, %v1126_v13 }
 0xeed   :  { %v1152_v25 = vadd.f32 %v2608_v60, %v1151_v22 }
 0xeef   :  { %2238 = vtanh.f32 %v1152_v25  ;;  %v1953_v27 = vmul.f32 -1.442695, %v1152_v25 }
 0xef0   :  { %2240 = vpow2.f32 %v1952_v51 }
 0xef1   :  { %2242 = vpow2.f32 %v1953_v27 }
 0xef5   :  { %v2237_v26 = vpop.eup %2236 }
 0xef6   :  { %1136 = vrot.lane.b32.xlu0 %v2237_v26, %s2433_s19 }
 0xef9   :  { %v2239_v2 = vpop.eup %2238 }
 0xefa   :  { %1162 = vrot.lane.b32.xlu1 %v2239_v2, %s2433_s19  ;;  %v2241_v29 = vpop.eup %2240 }
 0xefb   :  { %v1130_v30 = vadd.f32 1.0, %v2241_v29  ;;  %v2243_v31 = vpop.eup %2242 }
 0xefc   :  { %v1156_v33 = vadd.f32 1.0, %v2243_v31 }
 0xefd   :  { %2244 = vrcp.f32 %v1130_v30 }
 0xefe   :  { %2246 = vrcp.f32 %v1156_v33  ;;  %v2152_v33 = vld [vmem:[#allocation8 + $0x8] ss:$12 sps:$4 sm:$0xff]  }
 0xf07   :  { %v2245_v34 = vpop.eup %2244 }
 0xf08   :  { %v2247_v37 = vpop.eup %2246  ;;  %v1134_v40 = vmul.f32 %v2245_v34, %v2711_v55 }
 0xf09   :  { %v1160_v43 = vmul.f32 %v2247_v37, %v2715_v58 }
 0xf68   :  { %v1137_v35 = vpop.permute.xlu0 %1136 }
 0xf69   :  { %v1139_v36 = vmul.f32 %v2245_v34, %v1137_v35 }
 0xf6b   :  { %1141 = vrot.lane.b32.xlu0 %v1139_v36, %s2443_s3 }
 0xf6c   :  { %v1163_v49 = vpop.permute.xlu1 %1162 }
 0xf6d   :  { %v1165_v39 = vmul.f32 %v2247_v37, %v1163_v49 }
 0xf6f   :  { %1167 = vrot.lane.b32.xlu1 %v1165_v39, %s2443_s3 }
 0xfdd   :  { %v1142_v41 = vpop.permute.xlu0 %1141 }
 0xfde   :  { %v2743_v42 = vadd.f32 %v1142_v41, %v1134_v40 }
 0xfe0   :  { %2248 = vtanh.f32 %v2743_v42 }
 0xfe1   :  { %v1168_v44 = vpop.permute.xlu1 %1167 }
 0xfe2   :  { %v2747_v45 = vadd.f32 %v1168_v44, %v1160_v43  ;;  %v183_v43 = vadd.f32 %v2591_v50, %v2565_v14 }
 0xfe4   :  { %2250 = vtanh.f32 %v2747_v45 }
 0xfea   :  { %v2249_v47 = vpop.eup %2248 }
 0xfeb   :  { %1147 = vrot.lane.b32.xlu0 %v2249_v47, %s2433_s19 }
 0xfee   :  { %v2251_v52 = vpop.eup %2250 }
 0xfef   :  { %1173 = vrot.lane.b32.xlu1 %v2251_v52, %s2433_s19 }
0x105d   :  { %v1148_v53 = vpop.permute.xlu0 %1147 }
0x105e   :  { %v1150_v55 = vmul.f32 %v2245_v34, %v1148_v53  ;;  %v2153_v34 = vld [vmem:[#allocation8 + $0x20] ss:$12 sps:$4 sm:$0xff]  }
0x1061   :  { %v1174_v54 = vpop.permute.xlu1 %1173 }
0x1062   :  { %v2754_v56 = vmul.f32 %v2247_v37, %v1174_v54 }
0x1064   :  { %v1182_v57 = vpack.c.bf16 %v2754_v56, %v1150_v55 }
0x1066   :  { %1192 = vrot.lane.b32.xlu0 %v1182_v57, %s2443_s3 }
0x10d8   :  { %v1193_v58 = vpop.permute.xlu0 %1192 }
0x10d9   :  { %1960 = vmatmul.mubr.msk.bf16.vlgmr.msra.gmra.mrb[24].mxu1 %vm108_vm0, %v1193_v58  ;;  %2083 = vmatmul.mubr.msk.bf16.vlgmr.msra.gmra.mrb[28].mxu0 %vm108_vm0, %v1193_v58 }
0x10da   :  { %1414 = vmatpush1.bf16.msra.mxu1 %v2544_v3  ;;  %1445 = vmatprep.mubr.bf16.mxu1 %v2441_v0 }
0x10db   :  { %1415 = vmatprep.subr.bf16.mxu1 %v2548_v5  ;;  %2090 = vmatprep.mubr.msk.bf16.mxu0 %vm2445_vm1, %v2444_v32 }
0x10dc   :  { %2087 = vmatpush3.bf16.msra.mxu0 %v2152_v33 }
0x10dd   :  { %2088 = vmatprep.subr.bf16.mxu0 %v2444_v32 }
0x10de   :  { %1416 = vmatpush1.bf16.msra.mxu1 %v2550_v6 }
0x10e0   :  { %2089 = vmatpush3.bf16.msra.mxu0 %v2153_v34 }
0x10e1   :  { %2094 = vmatprep.subr.bf16.mxu0 %v2444_v32 }
0x11ac   :  { %v1263_v59 = vpop.f32.mrb[24].mxu1  ;;  %v1304_v61 = vpop.f32.mrb[28].mxu0 }
0x11ad   :  { %v1310_v62 = vadd.f32 %v1263_v59, %v180_v15  ;;  %v1265_v63 = vpop.f32.mrb[25].mxu1  ;;  %v2084_v1 = vpop.f32.mrb[29].mxu0 }
0x11ae   :  { %v1267_v4 = vpop.f32.mrb[26].mxu1  ;;  %v1306_v8 = vpop.f32.mrb[30].mxu0 }
0x11af   :  { %2252 = vtanh.f32 %v1310_v62  ;;  %v1335_v3 = vadd.f32 %v1306_v8, %v1265_v63  ;;  %v1268_v9 = vpop.f32.mrb[27].mxu1  ;;  %v2085_v10 = vpop.f32.mrb[31].mxu0  ;;  %v1962_v48 = vmul.f32 -1.442695, %v1310_v62 }
0x11b1   :  { %v1336_v5 = vadd.f32 %v2608_v60, %v1335_v3 }
0x11b3   :  { %2254 = vtanh.f32 %v1336_v5  ;;  %v1963_v12 = vmul.f32 -1.442695, %v1336_v5 }
0x11b4   :  { %2256 = vpow2.f32 %v1962_v48 }
0x11b5   :  { %2258 = vpow2.f32 %v1963_v12 }
0x11b9   :  { %v2253_v11 = vpop.eup %2252 }
0x11ba   :  { %1320 = vrot.lane.b32.xlu1 %v2253_v11, %s2433_s19 }
0x11bd   :  { %v2255_v6 = vpop.eup %2254 }
0x11be   :  { %1346 = vrot.lane.b32.xlu0 %v2255_v6, %s2433_s19  ;;  %v2257_v13 = vpop.eup %2256 }
0x11bf   :  { %v1314_v16 = vadd.f32 1.0, %v2257_v13  ;;  %v2259_v17 = vpop.eup %2258 }
0x11c0   :  { %v1340_v19 = vadd.f32 1.0, %v2259_v17  ;;  %v2156_v17 = vld [vmem:[#allocation8 + $0x4] ss:$12 sps:$4 sm:$0xff]  }
0x11c1   :  { %2260 = vrcp.f32 %v1314_v16  ;;  %v2154_v16 = vld [vmem:[#allocation8] ss:$12 sps:$4 sm:$0xff]   ;;  %1597 = vmatprep.subr.bf16.mxu1 %v2156_v17 }
0x11c2   :  { %2262 = vrcp.f32 %v1340_v19  ;;  %v2157_v19 = vld [vmem:[#allocation8 + $0x8] ss:$12 sps:$4 sm:$0xff]  }
0x11cb   :  { %v2261_v21 = vpop.eup %2260 }
0x11cc   :  { %v2263_v24 = vpop.eup %2262  ;;  %v1318_v2 = vmul.f32 %v2261_v21, %v2743_v42 }
0x11cd   :  { %v1344_v29 = vmul.f32 %v2263_v24, %v2747_v45 }
0x122c   :  { %v1321_v22 = vpop.permute.xlu1 %1320 }
0x122d   :  { %v1323_v23 = vmul.f32 %v2261_v21, %v1321_v22  ;;  %v2161_v22 = vld [vmem:[#allocation8 + $0x20] ss:$12 sps:$4 sm:$0xff]  }
0x122f   :  { %1325 = vrot.lane.b32.xlu1 %v1323_v23, %s2443_s3  ;;  %v2158_v23 = vld [vmem:[#allocation8 + $0x18] ss:$12 sps:$4 sm:$0xff]  }
0x1230   :  { %v1347_v25 = vpop.permute.xlu0 %1346 }
0x1231   :  { %v1349_v26 = vmul.f32 %v2263_v24, %v1347_v25 }
0x1233   :  { %1351 = vrot.lane.b32.xlu0 %v1349_v26, %s2443_s3 }
0x12a1   :  { %v1326_v51 = vpop.permute.xlu1 %1325 }
0x12a2   :  { %v2774_v27 = vadd.f32 %v1326_v51, %v1318_v2 }
0x12a4   :  { %2264 = vtanh.f32 %v2774_v27 }
0x12a5   :  { %v1352_v30 = vpop.permute.xlu0 %1351 }
0x12a6   :  { %v2778_v31 = vadd.f32 %v1352_v30, %v1344_v29 }
0x12a8   :  { %2266 = vtanh.f32 %v2778_v31 }
0x12ae   :  { %v2265_v35 = vpop.eup %2264 }
0x12af   :  { %1331 = vrot.lane.b32.xlu1 %v2265_v35, %s2433_s19 }
0x12b2   :  { %v2267_v36 = vpop.eup %2266 }
0x12b3   :  { %1357 = vrot.lane.b32.xlu0 %v2267_v36, %s2433_s19 }
0x1321   :  { %v1332_v37 = vpop.permute.xlu1 %1331 }
0x1322   :  { %v1334_v39 = vmul.f32 %v2261_v21, %v1332_v37  ;;  %v2160_v21 = vld [vmem:[#allocation8 + $0x1c] ss:$12 sps:$4 sm:$0xff]  }
0x1325   :  { %v1358_v49 = vpop.permute.xlu0 %1357 }
0x1326   :  { %v2785_v40 = vmul.f32 %v2263_v24, %v1358_v49 }
0x1328   :  { %v1366_v41 = vpack.c.bf16 %v2785_v40, %v1334_v39 }
0x132a   :  { %1376 = vrot.lane.b32.xlu1 %v1366_v41, %s2443_s3 }
0x139c   :  { %v1377_v42 = vpop.permute.xlu1 %1376 }
0x139d   :  { %1970 = vmatmul.mubr.msk.bf16.vlgmr.msra.gmra.mrb[28].mxu1 %vm108_vm0, %v1377_v42  ;;  %2091 = vmatmul.mubr.msk.bf16.vlgmr.msra.gmra.mrb[32].mxu0 %vm108_vm0, %v1377_v42 }
0x139e   :  { %1629 = vmatprep.mubr.bf16.mxu1 %v2441_v0  ;;  %2098 = vmatprep.mubr.msk.bf16.mxu0 %vm2445_vm1, %v2444_v32 }
0x139f   :  { %2095 = vmatpush3.bf16.msra.mxu0 %v2157_v19  ;;  %1598 = vmatpush1.bf16.msra.mxu1 %v2154_v16 }
0x13a0   :  { %2096 = vmatprep.subr.bf16.mxu0 %v2444_v32  ;;  %1599 = vmatprep.subr.bf16.mxu1 %v2160_v21 }
0x13a3   :  { %2097 = vmatpush3.bf16.msra.mxu0 %v2161_v22  ;;  %1600 = vmatpush1.bf16.msra.mxu1 %v2158_v23 }
0x1470   :  { %v1447_v44 = vpop.f32.mrb[28].mxu1  ;;  %v1488_v45 = vpop.f32.mrb[32].mxu0 }
0x1471   :  { %v1494_v46 = vadd.f32 %v1447_v44, %v183_v43  ;;  %v1449_v20 = vpop.f32.mrb[29].mxu1  ;;  %v2092_v47 = vpop.f32.mrb[33].mxu0 }
0x1472   :  { %v1451_v52 = vpop.f32.mrb[30].mxu1  ;;  %v1490_v53 = vpop.f32.mrb[34].mxu0 }
0x1473   :  { %2268 = vtanh.f32 %v1494_v46  ;;  %v1519_v54 = vadd.f32 %v1490_v53, %v1449_v20  ;;  %v1452_v55 = vpop.f32.mrb[31].mxu1  ;;  %v2093_v57 = vpop.f32.mrb[35].mxu0  ;;  %v1972_v14 = vmul.f32 -1.442695, %v1494_v46 }
0x1474   :  { %v2163_v57 = vld [vmem:[%s2915_s5 + $0x8] sm:$0xff]  }
0x1475   :  { %v1520_v58 = vadd.f32 %v2608_v60, %v1519_v54 }
0x1477   :  { %2270 = vtanh.f32 %v1520_v58  ;;  %v1973_v50 = vmul.f32 -1.442695, %v1520_v58 }
0x1478   :  { %2272 = vpow2.f32 %v1972_v14 }
0x1479   :  { %2274 = vpow2.f32 %v1973_v50 }
0x147d   :  { %v2269_v0 = vpop.eup %2268 }
0x147e   :  { %1504 = vrot.lane.b32.xlu0 %v2269_v0, %s2433_s19 }
0x1481   :  { %v2271_v15 = vpop.eup %2270 }
0x1482   :  { %1530 = vrot.lane.b32.xlu1 %v2271_v15, %s2433_s19  ;;  %v2273_v59 = vpop.eup %2272 }
0x1483   :  { %v1498_v61 = vadd.f32 1.0, %v2273_v59  ;;  %v2275_v62 = vpop.eup %2274 }
0x1484   :  { %v1524_v63 = vadd.f32 1.0, %v2275_v62 }
0x1485   :  { %2276 = vrcp.f32 %v1498_v61 }
0x1486   :  { %2278 = vrcp.f32 %v1524_v63 }
0x148f   :  { %v2277_v1 = vpop.eup %2276 }
0x1490   :  { %v2279_v3 = vpop.eup %2278  ;;  %v1502_v5 = vmul.f32 %v2277_v1, %v2774_v27 }
0x1491   :  { %v1528_v48 = vmul.f32 %v2279_v3, %v2778_v31 }
0x14f0   :  { %v1505_v4 = vpop.permute.xlu0 %1504 }
0x14f1   :  { %v1507_v8 = vmul.f32 %v2277_v1, %v1505_v4 }
0x14f3   :  { %1509 = vrot.lane.b32.xlu0 %v1507_v8, %s2443_s3 }
0x14f4   :  { %v1531_v9 = vpop.permute.xlu1 %1530 }
0x14f5   :  { %v1533_v10 = vmul.f32 %v2279_v3, %v1531_v9 }
0x14f7   :  { %1535 = vrot.lane.b32.xlu1 %v1533_v10, %s2443_s3 }
0x1565   :  { %v1510_v11 = vpop.permute.xlu0 %1509 }
0x1566   :  { %v2802_v6 = vadd.f32 %v1510_v11, %v1502_v5 }
0x1568   :  { %2280 = vtanh.f32 %v2802_v6 }
0x1569   :  { %v1536_v12 = vpop.permute.xlu1 %1535 }
0x156a   :  { %v1538_v13 = vadd.f32 %v1536_v12, %v1528_v48 }
0x156c   :  { %2282 = vtanh.f32 %v1538_v13 }
0x1572   :  { %v2281_v24 = vpop.eup %2280 }
0x1573   :  { %1515 = vrot.lane.b32.xlu0 %v2281_v24, %s2433_s19 }
0x1576   :  { %v2283_v25 = vpop.eup %2282 }
0x1577   :  { %1541 = vrot.lane.b32.xlu1 %v2283_v25, %s2433_s19 }
0x15e5   :  { %v1516_v26 = vpop.permute.xlu0 %1515 }
0x15e6   :  { %v1518_v51 = vmul.f32 %v2277_v1, %v1516_v26 }
0x15e9   :  { %v1542_v2 = vpop.permute.xlu1 %1541 }
0x15ea   :  { %v1544_v27 = vmul.f32 %v2279_v3, %v1542_v2 }
0x15ec   :  { %v1550_v29 = vpack.c.bf16 %v1544_v27, %v1518_v51 }
0x15ee   :  { %1560 = vrot.lane.b32.xlu0 %v1550_v29, %s2443_s3 }
0x1660   :  { %v1561_v30 = vpop.permute.xlu0 %1560 }
0x1661   :  { %1980 = vmatmul.mubr.msk.bf16.vlgmr.msra.gmra.mrb[32].mxu1 %vm108_vm0, %v1561_v30  ;;  %2099 = vmatmul.mubr.msk.bf16.vlgmr.msra.gmra.mrb[36].mxu0 %vm108_vm0, %v1561_v30 }
0x1734   :  { %v1631_v32 = vpop.f32.mrb[32].mxu1  ;;  %v1671_v31 = vpop.f32.mrb[36].mxu0 }
0x1735   :  { %v1632_v33 = vpop.f32.mrb[33].mxu1  ;;  %v2100_v34 = vpop.f32.mrb[37].mxu0 }
0x1736   :  { %v1634_v35 = vpop.f32.mrb[34].mxu1  ;;  %v1673_v36 = vpop.f32.mrb[38].mxu0 }
0x1737   :  { %v1677_v37 = vadd.f32 %v1673_v36, %v1632_v33  ;;  %v1635_v49 = vpop.f32.mrb[35].mxu1  ;;  %v2101_v39 = vpop.f32.mrb[39].mxu0 }
0x1739   :  { %v1678_v41 = vadd.f32 %v2608_v60, %v1677_v37 }
0x173b   :  { %2284 = vtanh.f32 %v1678_v41  ;;  %v1982_v43 = vmul.f32 -1.442695, %v1678_v41 }
0x173d   :  { %2286 = vpow2.f32 %v1982_v43 }
0x1745   :  { %v2285_v42 = vpop.eup %2284 }
0x1746   :  { %1688 = vrot.lane.b32.xlu1 %v2285_v42, %s2433_s19 }
0x1747   :  { %v2287_v44 = vpop.eup %2286 }
0x1748   :  { %v1682_v45 = vadd.f32 1.0, %v2287_v44 }
0x174a   :  { %2288 = vrcp.f32 %v1682_v45 }
0x1754   :  { %v2289_v46 = vpop.eup %2288 }
0x1755   :  { %v1686_v60 = vmul.f32 %v2289_v46, %v1538_v13 }
0x17b8   :  { %v1689_v20 = vpop.permute.xlu1 %1688 }
0x17b9   :  { %v1691_v47 = vmul.f32 %v2289_v46, %v1689_v20 }
0x17bb   :  { %1693 = vrot.lane.b32.xlu0 %v1691_v47, %s2443_s3 }
0x17bf   :  { %442 = vrot.lane.b32.xlu0 %v2626_v38, %s2443_s3 }
0x17c3   :  { %810 = vrot.lane.b32.xlu0 %v2690_v18, %s2443_s3  ;;  %v2162_v18 = vld [vmem:[%s2915_s5] sm:$0xff]   ;;  %s2447_s5 = smov [#allocation10]  }
0x17c4   :  { %2102 = vmatprep.subr.bf16.mxu1 %v2162_v18 }
0x17c5   :  { %2103 = vmatpush3.bf16.msra.mxu1 %v2162_v18 }
0x17c6   :  { %2104 = vmatprep.subr.bf16.mxu1 %v2163_v57 }
0x17c7   :  { %1178 = vrot.lane.b32.xlu0 %v2754_v56, %s2443_s3 }
0x17c9   :  { %2105 = vmatpush3.bf16.msra.mxu1 %v2163_v57 }
0x17cb   :  { %1546 = vrot.lane.b32.xlu0 %v1544_v27, %s2443_s3 }
0x17cf   :  { %1709 = vrot.lane.b32.xlu0 %v1518_v51, %s2443_s3 }
0x182d   :  { %v1694_v52 = vpop.permute.xlu0 %1693 }
0x182e   :  { %v1696_v53 = vadd.f32 %v1694_v52, %v1686_v60 }
0x1830   :  { %2290 = vtanh.f32 %v1696_v53  ;;  %1721 = vrot.lane.b32.xlu0 %v1696_v53, %s2446_s4 }
0x1831   :  { %v443_v54 = vpop.permute.xlu0 %442 }
0x1832   :  { %445 = vst.msk [vmem:[#allocation2] sm:$0xff] %vm108_vm0, %v443_v54 }
0x1835   :  { %v811_v38 = vpop.permute.xlu0 %810 }
0x1836   :  { %813 = vst.msk [vmem:[#allocation2 + $0x10] sm:$0xff] %vm108_vm0, %v811_v38 }
0x1839   :  { %v1179_v56 = vpop.permute.xlu0 %1178 }
0x183a   :  { %v2291_v55 = vpop.eup %2290  ;;  %1181 = vst.msk [vmem:[#allocation2 + $0x20] sm:$0xff] %vm108_vm0, %v1179_v56 }
0x183b   :  { %1699 = vrot.lane.b32.xlu1 %v2291_v55, %s2433_s19  ;;  %s1863_s19 = sshll.u32 %s2447_s5, 4  ;;  %s1864_s19 = int_to_ptr.vmem [resolvable:$true] %s1863_s19 }
0x183c   :  { %s2358_s16 = scalar_lea.vmem %s1864_s19, 256  ;;  %p2363_p11 = scmp.lt.s32.totalorder %s1864_s19, %s1864_s19 }
0x183d   :  { %v1547_v58 = vpop.permute.xlu0 %1546  ;;  %v1728_v63 = vld [vmem:[#allocation2 + $0x10] sm:$0xff]  ;;  %p2359_p10 = scmp.ne.s32.totalorder %s1864_s19, %s2358_s16  ;;  %p2364_p12 = scmp.lt.s32.totalorder %s2358_s16, %s2358_s16 }
0x183e   :  { %1549 = vst.msk [vmem:[#allocation2 + $0x30] sm:$0xff] %vm108_vm0, %v1547_v58 }
0x183f   :  { %626 = vrot.lane.b32.xlu1 %v2658_v28, %s2443_s3  ;;  %p2365_p13 = por %p2364_p12, %p2363_p11 }
0x1841   :  { %v1710_v0 = vpop.permute.xlu0 %1709  ;;  %v1730_v8 = vld [vmem:[#allocation2 + $0x20] sm:$0xff]  ;;  %p2366_p0 = pnand %p2365_p13, %p2359_p10 }
0x1842   :  { %1712 = vst.msk [vmem:[#allocation10] sm:$0xff] %vm108_vm0, %v1710_v0 }
0x1843   :  { %994 = vrot.lane.b32.xlu1 %v2722_v7, %s2443_s3  ;;  %v1726_v7 = vld [vmem:[#allocation2] sm:$0xff] }
0x1845   :  { %v1732_v11 = vld [vmem:[#allocation2 + $0x30] sm:$0xff] }
0x1847   :  { %1362 = vrot.lane.b32.xlu1 %v2785_v40, %s2443_s3 }
0x18a2   :  { %v1722_v15 = vpop.permute.xlu0 %1721 }
0x18a3   :  { %1725 = vst.msk [vmem:[#allocation12 + $0x8] sm:$0xff] %vm108_vm0, %v1722_v15 }
0x18ad   :  { %v1700_v14 = vpop.permute.xlu1 %1699 }
0x18ae   :  { %v1702_v50 = vmul.f32 %v2289_v46, %v1700_v14 }
0x18b0   :  { %1704 = vrot.lane.b32.xlu1 %v1702_v50, %s2443_s3 }
0x18b1   :  { %v627_v59 = vpop.permute.xlu1 %626 }
0x18b2   :  { %629 = vst.msk [vmem:[#allocation2 + $0x8] sm:$0xff] %vm108_vm0, %v627_v59 }
0x18b4   :  { %1714 = vrot.lane.b32.xlu1 %v2802_v6, %s2446_s4 }
0x18b5   :  { %v995_v28 = vpop.permute.xlu1 %994 }
0x18b6   :  { %997 = vst.msk [vmem:[#allocation2 + $0x18] sm:$0xff] %vm108_vm0, %v995_v28 }
0x18b9   :  { %v1363_v61 = vpop.permute.xlu1 %1362  ;;  %v1727_v62 = vld [vmem:[#allocation2 + $0x8] sm:$0xff] }
0x18ba   :  { %1365 = vst.msk [vmem:[#allocation2 + $0x28] sm:$0xff] %vm108_vm0, %v1363_v61  ;;  %v1734_v40 = vpack.c.bf16 %v1727_v62, %v1726_v7 }
0x18bc   :  { %2106 = vmatprep.mubr.msk.bf16.mxu1 %vm108_vm0, %v1734_v40 }
0x18bd   :  { %v1729_v1 = vld [vmem:[#allocation2 + $0x18] sm:$0xff] }
0x18be   :  { %v1735_v4 = vpack.c.bf16 %v1729_v1, %v1728_v63 }
0x18c0   :  { %2107 = vmatmul.mubr.msk.bf16.vlgmr.msra.gmra.mrb[36].mxu1 %vm108_vm0, %v1735_v4 }
0x18c1   :  { %v1731_v3 = vld [vmem:[#allocation2 + $0x28] sm:$0xff] }
0x18c2   :  { %v1736_v9 = vpack.c.bf16 %v1731_v3, %v1730_v8 }
0x18c4   :  { %2110 = vmatprep.mubr.msk.bf16.mxu1 %vm108_vm0, %v1736_v9 }
0x1922   :  { %v1705_v10 = vpop.permute.xlu1 %1704 }
0x1923   :  { %1707 = vst.msk [vmem:[#allocation2 + $0x38] sm:$0xff] %vm108_vm0, %v1705_v10  ;;  %1719 = vst.msk [vmem:[#allocation10 + $0x8] sm:$0xff] %vm108_vm0, %v1705_v10 }
0x1926   :  { %v1715_v5 = vpop.permute.xlu1 %1714 }
0x1927   :  { %1717 = vst.msk [vmem:[#allocation12] sm:$0xff] %vm108_vm0, %v1715_v5 }
0x192a   :  { %v1733_v6 = vld [vmem:[#allocation2 + $0x38] sm:$0xff] }
0x192b   :  { %v1737_v48 = vpack.c.bf16 %v1733_v6, %v1732_v11 }
0x192d   :  { %2111 = vmatmul.mubr.msk.bf16.gmra.mrb[40].mxu1 %vm108_vm0, %v1737_v48 }
0x192e   :  { %2369 = shalt.err (!%p2366_p0)
}
0x192f   :  { %s2370_s20 = scalar_lea.hbm %s2918_s8, 256 }
0x1930   :  { %p2371_p1 = scmp.ne.s32.totalorder %s2918_s8, %s2370_s20  ;;  %p2374_p2 = scmp.lt.u32.totalorder %s2370_s20, %s2918_s8 }
0x1932   :  { %p2376_p3 = pnand %p2374_p2, %p2371_p1 }
0x1934   :  { %2379 = shalt.err (!%p2376_p3)
}
0x1935   :  { %1869 = dma.vmem_to_hbm [thread:$0]  %s1864_s19, 256, %s2918_s8, [#allocation11], %s2436_s1, %s2436_s1, %s2437_s10  }
0x1936   :  { %s2448_s24 = smov [#allocation12]  }
0x1937   :  { %s1875_s27 = sshll.u32 %s2448_s24, 4  ;;  %s1876_s27 = int_to_ptr.vmem [resolvable:$true] %s1875_s27 }
0x1938   :  { %s2380_s28 = scalar_lea.vmem %s1876_s27, 256  ;;  %p2385_p5 = scmp.lt.s32.totalorder %s1876_s27, %s1876_s27 }
0x1939   :  { %p2381_p4 = scmp.ne.s32.totalorder %s1876_s27, %s2380_s28  ;;  %p2386_p6 = scmp.lt.s32.totalorder %s2380_s28, %s2380_s28 }
0x193b   :  { %p2387_p7 = por %p2386_p6, %p2385_p5 }
0x193d   :  { %p2388_p8 = pnand %p2387_p7, %p2381_p4 }
0x193f   :  { %2391 = shalt.err (!%p2388_p8)
}
0x1940   :  { %s2392_s3 = scalar_lea.hbm %s2919_s9, 256 }
0x1941   :  { %p2393_p9 = scmp.ne.s32.totalorder %s2919_s9, %s2392_s3  ;;  %p2396_p10 = scmp.lt.u32.totalorder %s2392_s3, %s2919_s9 }
0x1943   :  { %p2398_p11 = pnand %p2396_p10, %p2393_p9 }
0x1945   :  { %2401 = shalt.err (!%p2398_p11)
}
0x1946   :  { %1881 = dma.vmem_to_hbm [thread:$0]  %s1876_s27, 256, %s2919_s9, [#allocation11], %s2436_s1, %s2436_s1, %s2437_s10  }
0x1947   :  { %v1983_v12 = vld [vmem:[%s2916_s6] ss:$0 sm:$0xff]  ;;  %s2449_s6 = smov [#allocation9]  }
0x1948   :  { %s1851_s9 = sshll.u32 %s2449_s6, 4  ;;  %s1852_s9 = int_to_ptr.vmem [resolvable:$true] %s1851_s9 }
0x1949   :  { %s2402_s5 = scalar_lea.vmem %s1852_s9, 1024  ;;  %p2407_p13 = scmp.lt.s32.totalorder %s1852_s9, %s1852_s9 }
0x194a   :  { %p2403_p12 = scmp.ne.s32.totalorder %s1852_s9, %s2402_s5  ;;  %p2408_p0 = scmp.lt.s32.totalorder %s2402_s5, %s2402_s5 }
0x194c   :  { %p2409_p1 = por %p2408_p0, %p2407_p13 }
0x194e   :  { %p2410_p2 = pnand %p2409_p1, %p2403_p12 }
0x1993   :  { %v2108_v13 = vpop.f32.mrb[36].mxu1 }
0x1994   :  { %v1816_v16 = vadd.f32 %v2108_v13, %v1983_v12  ;;  %v1807_v17 = vpop.f32.mrb[37].mxu1 }
0x1995   :  { %v1808_v19 = vadd.f32 %v1983_v12, %v1807_v17  ;;  %v2109_v21 = vpop.f32.mrb[38].mxu1 }
0x1996   :  { %1840 = vst.msk [vmem:[#allocation9 + $0x10] sm:$0xff] %vm108_vm0, %v1816_v16  ;;  %v1819_v22 = vadd.f32 %v2109_v21, %v1983_v12  ;;  %v1810_v23 = vpop.f32.mrb[39].mxu1 }
0x1997   :  { %1838 = vst.msk [vmem:[#allocation9] sm:$0xff] %vm108_vm0, %v1808_v19  ;;  %v1811_v24 = vadd.f32 %v1983_v12, %v1810_v23 }
0x1998   :  { %1841 = vst.msk [vmem:[#allocation9 + $0x18] sm:$0xff] %vm108_vm0, %v1819_v22 }
0x1999   :  { %1839 = vst.msk [vmem:[#allocation9 + $0x8] sm:$0xff] %vm108_vm0, %v1811_v24 }
0x1a00   :  { %v2112_v25 = vpop.f32.mrb[40].mxu1 }
0x1a01   :  { %v1832_v26 = vadd.f32 %v2112_v25, %v1983_v12  ;;  %v1823_v2 = vpop.f32.mrb[41].mxu1 }
0x1a02   :  { %v1824_v51 = vadd.f32 %v1983_v12, %v1823_v2  ;;  %v2113_v27 = vpop.f32.mrb[42].mxu1 }
0x1a03   :  { %1844 = vst.msk [vmem:[#allocation9 + $0x30] sm:$0xff] %vm108_vm0, %v1832_v26  ;;  %v1835_v29 = vadd.f32 %v2113_v27, %v1983_v12  ;;  %v1826_v30 = vpop.f32.mrb[43].mxu1 }
0x1a04   :  { %1842 = vst.msk [vmem:[#allocation9 + $0x20] sm:$0xff] %vm108_vm0, %v1824_v51  ;;  %v1827_v32 = vadd.f32 %v1983_v12, %v1826_v30 }
0x1a05   :  { %1845 = vst.msk [vmem:[#allocation9 + $0x38] sm:$0xff] %vm108_vm0, %v1835_v29 }
0x1a06   :  { %1843 = vst.msk [vmem:[#allocation9 + $0x28] sm:$0xff] %vm108_vm0, %v1827_v32 }
0x1a07   :  { %2413 = shalt.err (!%p2410_p2)
}
0x1a08   :  { %s2414_s17 = scalar_lea.hbm %s2917_s7, 1024 }
0x1a09   :  { %p2415_p3 = scmp.ne.s32.totalorder %s2917_s7, %s2414_s17  ;;  %p2418_p4 = scmp.lt.u32.totalorder %s2414_s17, %s2917_s7 }
0x1a0b   :  { %p2420_p5 = pnand %p2418_p4, %p2415_p3 }
0x1a0d   :  { %2423 = shalt.err (!%p2420_p5)
}
0x1a0e   :  { %1857 = dma.vmem_to_hbm [thread:$0]  %s1852_s9, 1024, %s2917_s7, [#allocation5], %s2436_s1, %s2436_s1, %s2437_s10  }
0x1a0f   :  { %2428 = dma.done.wait [#allocation5], 1024  }
0x1a10   :  { %2429 = vsyncadd [#allocation5], 4294966272 }
0x1a11   :  { %2430 = dma.done.wait [#allocation11], 512  }
0x1a12   :  { %2431 = vsyncadd [#allocation11], 4294966784 }
0x1a13   :  { %1891 = vsyncpa [#allocation4], 1 }
0x1a14   :  { %1892 = vsyncpa [#allocation7], 1 }
0x1a15   :  { %1893 = vsyncpa [#allocation5], 1 }
0x1a16   :  { %1894 = vsyncpa [#allocation11], 1 }

</bundles_post_ra>
